<compile_context>
chip_gen: v7x
topology: tpu7x:2x2x1
jax: 0.10.0
libtpu: 0.0.40
codegen_flags: <defaults>
</compile_context>

<pallas_src>
import jax
import jax.numpy as jnp
from jax import lax
from jax.experimental import pallas as pl
from jax.experimental.pallas import tpu as pltpu  # noqa: F401  (TPU backend)

# ---------------- model dims (small, consistent with the module) ----------------
B = 2            # batch
S = 8            # sequence length
E = 32           # embed_dim
NUM_HEADS = 4
HEAD_DIM = E // NUM_HEADS
H = 64           # tsfm_hidden_dim (SwiGLU hidden)
LN_EPS = 1e-5
R = B * S        # flattened rows fed to the MXU


# ---------------------------------- kernel --------------------------------------
def _layer_norm(v, w_row, b_row):
    # v: (R, E); w_row/b_row: (1, E)
    mu = jnp.mean(v, axis=-1, keepdims=True)
    var = jnp.mean((v - mu) ** 2, axis=-1, keepdims=True)
    return (v - mu) * lax.rsqrt(var + LN_EPS) * w_row + b_row


def swiglu_attn_block_kernel(
    x_ref,                      # (B, S, E)
    ln1w_ref, ln1b_ref,         # (1, E)
    wq_ref, bq_ref,             # (E, E), (1, E)
    wk_ref, bk_ref,             # (E, E), (1, E)
    wv_ref, bv_ref,             # (E, E), (1, E)
    wo_ref, bo_ref,             # (E, E), (1, E)
    ln2w_ref, ln2b_ref,         # (1, E)
    w1_ref, b1_ref,             # (E, 2H), (1, 2H)
    w2_ref, b2_ref,             # (H, E),  (1, E)
    o_ref,                      # (B, S, E)
):
    # Flatten batch into matmul rows: (B, S, E) -> (B*S, E). Collapsing leading dims
    # is a sublane-only relayout (cheap), and doubles MXU row occupancy vs per-batch.
    x = x_ref[...].reshape(R, E)

    # ---- LayerNorm 1 + Q/K/V projections (separate (E,E) weights: no lane-slicing
    #      of a fused 3E output needed) ----
    xn = _layer_norm(x, ln1w_ref[...], ln1b_ref[...])
    q = jnp.dot(xn, wq_ref[...], preferred_element_type=jnp.float32) + bq_ref[...]
    k = jnp.dot(xn, wk_ref[...], preferred_element_type=jnp.float32) + bk_ref[...]
    v = jnp.dot(xn, wv_ref[...], preferred_element_type=jnp.float32) + bv_ref[...]

    # ---- multi-head self-attention per (batch, head). Per-head contexts are
    #      concatenated so the output projection is a single K=E matmul instead of
    #      NUM_HEADS tiny K=HEAD_DIM matmuls + accumulation adds. ----
    scale = 1.0 / (HEAD_DIM ** 0.5)
    batch_ctx = []
    for b in range(B):
        rows = slice(b * S, (b + 1) * S)
        head_ctx = []
        for h in range(NUM_HEADS):
            cols = slice(h * HEAD_DIM, (h + 1) * HEAD_DIM)
            qh = q[rows, cols] * scale          # (S, hd)
            kh = k[rows, cols]                  # (S, hd)
            vh = v[rows, cols]                  # (S, hd)
            s = jnp.dot(qh, kh.T, preferred_element_type=jnp.float32)   # (S, S)
            s = s - jnp.max(s, axis=-1, keepdims=True)
            p = jnp.exp(s)
            l = jnp.sum(p, axis=-1, keepdims=True)                      # (S, 1)
            ch = jnp.dot(p, vh, preferred_element_type=jnp.float32)     # (S, hd)
            # Normalization deferred past the PV matmul; reciprocal on the EUP slot.
            head_ctx.append(ch * pl.reciprocal(l, approx=True))
        batch_ctx.append(jnp.concatenate(head_ctx, axis=-1))            # (S, E)
    ctx = jnp.concatenate(batch_ctx, axis=0)                            # (R, E)

    attn = jnp.dot(ctx, wo_ref[...], preferred_element_type=jnp.float32) + bo_ref[...]

    # ---- residual 1 (attn_dropout is identity, p=0) ----
    x = x + attn

    # ---- LayerNorm 2 + SwiGLU FFN ----
    xn2 = _layer_norm(x, ln2w_ref[...], ln2b_ref[...])
    h1 = jnp.dot(xn2, w1_ref[...], preferred_element_type=jnp.float32) + b1_ref[...]
    x1 = h1[:, :H]
    x2 = h1[:, H:]
    gated = x1 * jax.nn.sigmoid(x1) * x2                                # SiLU(x1) * x2
    ffn = jnp.dot(gated, w2_ref[...], preferred_element_type=jnp.float32) + b2_ref[...]

    # ---- residual 2 (ffn_dropout is identity, p=0) ----
    o_ref[...] = (x + ffn).reshape(B, S, E).astype(o_ref.dtype)


# --------------------------------- wrapper ---------------------------------------
def prepare_params(params):
    """One-time conversion of PyTorch-layout weights to kernel (in, out) layout.
    Hoisted out of the per-call path so no transpose/reshape traffic per forward."""
    row = lambda t: t.reshape(1, -1)
    ipw = params["in_proj_weight"]          # (3E, E): rows = [Wq; Wk; Wv]
    ipb = params["in_proj_bias"]            # (3E,)
    return {
        "ln1w": row(params["ln1_weight"]), "ln1b": row(params["ln1_bias"]),
        "wq": ipw[:E].T,        "bq": row(ipb[:E]),
        "wk": ipw[E:2 * E].T,   "bk": row(ipb[E:2 * E]),
        "wv": ipw[2 * E:].T,    "bv": row(ipb[2 * E:]),
        "wo": params["out_proj_weight"].T,  "bo": row(params["out_proj_bias"]),
        "ln2w": row(params["ln2_weight"]), "ln2b": row(params["ln2_bias"]),
        "w1": params["lin1_weight"].T,      "b1": row(params["lin1_bias"]),
        "w2": params["lin2_weight"].T,      "b2": row(params["lin2_bias"]),
    }


@jax.jit
def swiglu_attention_block(x, prep):
    """x: (B, S, E) float32. prep: output of prepare_params()."""
    # Single invocation, no grid: every operand is a single full block in VMEM
    # (total footprint ~50 KB, trivially fits on v5e/v6e/v7x).
    return pl.pallas_call(
        swiglu_attn_block_kernel,
        out_shape=jax.ShapeDtypeStruct((B, S, E), jnp.float32),
    )(
        x,
        prep["ln1w"], prep["ln1b"],
        prep["wq"], prep["bq"],
        prep["wk"], prep["bk"],
        prep["wv"], prep["bv"],
        prep["wo"], prep["bo"],
        prep["ln2w"], prep["ln2b"],
        prep["w1"], prep["b1"],
        prep["w2"], prep["b2"],
    )


# ------------------------- pure-JAX reference (for checking) ---------------------
def reference(x, params):
    def ln(v, w, b):
        mu = jnp.mean(v, axis=-1, keepdims=True)
        var = jnp.mean((v - mu) ** 2, axis=-1, keepdims=True)
        return (v - mu) / jnp.sqrt(var + LN_EPS) * w + b

    xn = ln(x, params["ln1_weight"], params["ln1_bias"])
    qkv = xn @ params["in_proj_weight"].T + params["in_proj_bias"]
    q, k, v = jnp.split(qkv, 3, axis=-1)

    def split_heads(t):  # (B,S,E) -> (B,nh,S,hd)
        return t.reshape(B, S, NUM_HEADS, HEAD_DIM).transpose(0, 2, 1, 3)

    qh, kh, vh = split_heads(q), split_heads(k), split_heads(v)
    scores = jnp.einsum("bhqd,bhkd->bhqk", qh, kh) / (HEAD_DIM ** 0.5)
    probs = jax.nn.softmax(scores, axis=-1)
    ctx = jnp.einsum("bhqk,bhkd->bhqd", probs, vh)
    ctx = ctx.transpose(0, 2, 1, 3).reshape(B, S, E)
    attn_out = ctx @ params["out_proj_weight"].T + params["out_proj_bias"]
    x = x + attn_out

    xn2 = ln(x, params["ln2_weight"], params["ln2_bias"])
    h1 = xn2 @ params["lin1_weight"].T + params["lin1_bias"]
    x1, x2 = h1[..., :H], h1[..., H:]
    ffn = (jax.nn.silu(x1) * x2) @ params["lin2_weight"].T + params["lin2_bias"]
    return x + ffn


# ------------------------------------ main ---------------------------------------
def make_params(key):
    """PyTorch-shaped weights: nn.Linear(in, out).weight has shape (out, in)."""
    ks = jax.random.split(key, 12)
    n = lambda k, shape, s=0.05: (s * jax.random.normal(k, shape)).astype(jnp.float32)
    return {
        "ln1_weight": 1.0 + n(ks[0], (E,)),
        "ln1_bias": n(ks[1], (E,)),
        "in_proj_weight": n(ks[2], (3 * E, E)),
        "in_proj_bias": n(ks[3], (3 * E,)),
        "out_proj_weight": n(ks[4], (E, E)),
        "out_proj_bias": n(ks[5], (E,)),
        "ln2_weight": 1.0 + n(ks[6], (E,)),
        "ln2_bias": n(ks[7], (E,)),
        "lin1_weight": n(ks[8], (2 * H, E)),   # nn.Linear(E, 2H).weight -> (2H, E)
        "lin1_bias": n(ks[9], (2 * H,)),
        "lin2_weight": n(ks[10], (E, H)),      # nn.Linear(H, E).weight -> (E, H)  (fixed)
        "lin2_bias": n(ks[11], (E,)),
    }


if __name__ == "__main__":
    key = jax.random.PRNGKey(0)
    kx, kp = jax.random.split(key)
    x = jax.random.normal(kx, (B, S, E), dtype=jnp.float32)
    params = make_params(kp)

    prep = prepare_params(params)          # one-time weight re-layout (not per call)

    out = swiglu_attention_block(x, prep)
    out = jax.block_until_ready(out)

    ref = reference(x, params)
    assert out.shape == (B, S, E)
    max_err = jnp.max(jnp.abs(out - ref))
    # Tolerance slightly looser than 1e-4 because the softmax denominator uses the
    # EUP approximate reciprocal (pl.reciprocal(..., approx=True)).
    assert jnp.allclose(out, ref, atol=2e-3, rtol=2e-3), f"max abs err = {max_err}"
    print("KERNEL_OK")
</pallas_src>

<mosaic_0001>
module attributes {stable_mosaic.version = 11 : i64} {
  func.func @swiglu_attn_block_kernel(%arg0: memref<2x8x32xf32, #tpu.memory_space<vmem>>, %arg1: memref<1x32xf32, #tpu.memory_space<vmem>>, %arg2: memref<1x32xf32, #tpu.memory_space<vmem>>, %arg3: memref<32x32xf32, #tpu.memory_space<vmem>>, %arg4: memref<1x32xf32, #tpu.memory_space<vmem>>, %arg5: memref<32x32xf32, #tpu.memory_space<vmem>>, %arg6: memref<1x32xf32, #tpu.memory_space<vmem>>, %arg7: memref<32x32xf32, #tpu.memory_space<vmem>>, %arg8: memref<1x32xf32, #tpu.memory_space<vmem>>, %arg9: memref<32x32xf32, #tpu.memory_space<vmem>>, %arg10: memref<1x32xf32, #tpu.memory_space<vmem>>, %arg11: memref<1x32xf32, #tpu.memory_space<vmem>>, %arg12: memref<1x32xf32, #tpu.memory_space<vmem>>, %arg13: memref<32x128xf32, #tpu.memory_space<vmem>>, %arg14: memref<1x128xf32, #tpu.memory_space<vmem>>, %arg15: memref<64x32xf32, #tpu.memory_space<vmem>>, %arg16: memref<1x32xf32, #tpu.memory_space<vmem>>, %arg17: memref<2x8x32xf32, #tpu.memory_space<vmem>>) attributes {dimension_semantics = [], scalar_prefetch = 0 : i64, scratch_operands = 0 : i64, tpu.core_type = #tpu.core_type<tc>} {
    %c0 = arith.constant 0 : index
    %c0_0 = arith.constant 0 : index
    %c0_1 = arith.constant 0 : index
    %0 = vector.load %arg0[%c0, %c0_0, %c0_1] : memref<2x8x32xf32, #tpu.memory_space<vmem>>, vector<2x8x32xf32>
    %1 = vector.shape_cast %0 : vector<2x8x32xf32> to vector<16x32xf32>
    %c0_2 = arith.constant 0 : index
    %c0_3 = arith.constant 0 : index
    %2 = vector.load %arg1[%c0_2, %c0_3] : memref<1x32xf32, #tpu.memory_space<vmem>>, vector<1x32xf32>
    %c0_4 = arith.constant 0 : index
    %c0_5 = arith.constant 0 : index
    %3 = vector.load %arg2[%c0_4, %c0_5] : memref<1x32xf32, #tpu.memory_space<vmem>>, vector<1x32xf32>
    %cst = arith.constant dense<0.000000e+00> : vector<16xf32>
    %4 = vector.multi_reduction <add>, %1, %cst [1] : vector<16x32xf32> to vector<16xf32>
    %5 = vector.shape_cast %4 : vector<16xf32> to vector<16x1xf32>
    %cst_6 = arith.constant 3.200000e+01 : f32
    %6 = vector.broadcast %cst_6 : f32 to vector<16x1xf32>
    %7 = arith.divf %5, %6 : vector<16x1xf32>
    %8 = vector.broadcast %7 : vector<16x1xf32> to vector<16x32xf32>
    %9 = arith.subf %1, %8 : vector<16x32xf32>
    %10 = arith.mulf %9, %9 : vector<16x32xf32>
    %cst_7 = arith.constant dense<0.000000e+00> : vector<16xf32>
    %11 = vector.multi_reduction <add>, %10, %cst_7 [1] : vector<16x32xf32> to vector<16xf32>
    %12 = vector.shape_cast %11 : vector<16xf32> to vector<16x1xf32>
    %cst_8 = arith.constant 3.200000e+01 : f32
    %13 = vector.broadcast %cst_8 : f32 to vector<16x1xf32>
    %14 = arith.divf %12, %13 : vector<16x1xf32>
    %15 = vector.broadcast %7 : vector<16x1xf32> to vector<16x32xf32>
    %16 = arith.subf %1, %15 : vector<16x32xf32>
    %cst_9 = arith.constant 9.99999974E-6 : f32
    %17 = vector.broadcast %cst_9 : f32 to vector<16x1xf32>
    %18 = arith.addf %14, %17 : vector<16x1xf32>
    %19 = math.rsqrt %18 : vector<16x1xf32>
    %20 = vector.broadcast %19 : vector<16x1xf32> to vector<16x32xf32>
    %21 = arith.mulf %16, %20 : vector<16x32xf32>
    %22 = vector.broadcast %2 : vector<1x32xf32> to vector<16x32xf32>
    %23 = arith.mulf %21, %22 : vector<16x32xf32>
    %24 = vector.broadcast %3 : vector<1x32xf32> to vector<16x32xf32>
    %25 = arith.addf %23, %24 : vector<16x32xf32>
    %c0_10 = arith.constant 0 : index
    %c0_11 = arith.constant 0 : index
    %26 = vector.load %arg3[%c0_10, %c0_11] : memref<32x32xf32, #tpu.memory_space<vmem>>, vector<32x32xf32>
    %cst_12 = arith.constant dense<0.000000e+00> : vector<16x32xf32>
    %27 = tpu.matmul %25, %26, %cst_12 {dimension_numbers = #tpu.dot_dimension_numbers<[1], [0], [0], [1], [0, 0, 1, 1], [], []>} : vector<16x32xf32>, vector<32x32xf32>, vector<16x32xf32> -> vector<16x32xf32>
    %c0_13 = arith.constant 0 : index
    %c0_14 = arith.constant 0 : index
    %28 = vector.load %arg4[%c0_13, %c0_14] : memref<1x32xf32, #tpu.memory_space<vmem>>, vector<1x32xf32>
    %29 = vector.broadcast %28 : vector<1x32xf32> to vector<16x32xf32>
    %30 = arith.addf %27, %29 : vector<16x32xf32>
    %c0_15 = arith.constant 0 : index
    %c0_16 = arith.constant 0 : index
    %31 = vector.load %arg5[%c0_15, %c0_16] : memref<32x32xf32, #tpu.memory_space<vmem>>, vector<32x32xf32>
    %cst_17 = arith.constant dense<0.000000e+00> : vector<16x32xf32>
    %32 = tpu.matmul %25, %31, %cst_17 {dimension_numbers = #tpu.dot_dimension_numbers<[1], [0], [0], [1], [0, 0, 1, 1], [], []>} : vector<16x32xf32>, vector<32x32xf32>, vector<16x32xf32> -> vector<16x32xf32>
    %c0_18 = arith.constant 0 : index
    %c0_19 = arith.constant 0 : index
    %33 = vector.load %arg6[%c0_18, %c0_19] : memref<1x32xf32, #tpu.memory_space<vmem>>, vector<1x32xf32>
    %34 = vector.broadcast %33 : vector<1x32xf32> to vector<16x32xf32>
    %35 = arith.addf %32, %34 : vector<16x32xf32>
    %c0_20 = arith.constant 0 : index
    %c0_21 = arith.constant 0 : index
    %36 = vector.load %arg7[%c0_20, %c0_21] : memref<32x32xf32, #tpu.memory_space<vmem>>, vector<32x32xf32>
    %cst_22 = arith.constant dense<0.000000e+00> : vector<16x32xf32>
    %37 = tpu.matmul %25, %36, %cst_22 {dimension_numbers = #tpu.dot_dimension_numbers<[1], [0], [0], [1], [0, 0, 1, 1], [], []>} : vector<16x32xf32>, vector<32x32xf32>, vector<16x32xf32> -> vector<16x32xf32>
    %c0_23 = arith.constant 0 : index
    %c0_24 = arith.constant 0 : index
    %38 = vector.load %arg8[%c0_23, %c0_24] : memref<1x32xf32, #tpu.memory_space<vmem>>, vector<1x32xf32>
    %39 = vector.broadcast %38 : vector<1x32xf32> to vector<16x32xf32>
    %40 = arith.addf %37, %39 : vector<16x32xf32>
    %41 = vector.extract_strided_slice %30 {offsets = [0, 0], sizes = [8, 8], strides = [1, 1]} : vector<16x32xf32> to vector<8x8xf32>
    %cst_25 = arith.constant 0.353553385 : f32
    %42 = vector.broadcast %cst_25 : f32 to vector<8x8xf32>
    %43 = arith.mulf %41, %42 : vector<8x8xf32>
    %44 = vector.extract_strided_slice %35 {offsets = [0, 0], sizes = [8, 8], strides = [1, 1]} : vector<16x32xf32> to vector<8x8xf32>
    %45 = vector.extract_strided_slice %40 {offsets = [0, 0], sizes = [8, 8], strides = [1, 1]} : vector<16x32xf32> to vector<8x8xf32>
    %46 = tpu.transpose %44, [1, 0] : vector<8x8xf32> -> vector<8x8xf32>
    %cst_26 = arith.constant dense<0.000000e+00> : vector<8x8xf32>
    %47 = tpu.matmul %43, %46, %cst_26 {dimension_numbers = #tpu.dot_dimension_numbers<[1], [0], [0], [1], [0, 0, 1, 1], [], []>} : vector<8x8xf32>, vector<8x8xf32>, vector<8x8xf32> -> vector<8x8xf32>
    %cst_27 = arith.constant dense<0xFF800000> : vector<8xf32>
    %48 = vector.multi_reduction <maximumf>, %47, %cst_27 [1] : vector<8x8xf32> to vector<8xf32>
    %49 = vector.shape_cast %48 : vector<8xf32> to vector<8x1xf32>
    %50 = vector.broadcast %49 : vector<8x1xf32> to vector<8x8xf32>
    %51 = arith.subf %47, %50 : vector<8x8xf32>
    %52 = math.exp %51 : vector<8x8xf32>
    %cst_28 = arith.constant dense<0.000000e+00> : vector<8xf32>
    %53 = vector.multi_reduction <add>, %52, %cst_28 [1] : vector<8x8xf32> to vector<8xf32>
    %54 = vector.shape_cast %53 : vector<8xf32> to vector<8x1xf32>
    %cst_29 = arith.constant dense<0.000000e+00> : vector<8x8xf32>
    %55 = tpu.matmul %52, %45, %cst_29 {dimension_numbers = #tpu.dot_dimension_numbers<[1], [0], [0], [1], [0, 0, 1, 1], [], []>} : vector<8x8xf32>, vector<8x8xf32>, vector<8x8xf32> -> vector<8x8xf32>
    %56 = tpu.reciprocal %54 {approx = true} : vector<8x1xf32> -> vector<8x1xf32>
    %57 = vector.broadcast %56 : vector<8x1xf32> to vector<8x8xf32>
    %58 = arith.mulf %55, %57 : vector<8x8xf32>
    %59 = vector.extract_strided_slice %30 {offsets = [0, 8], sizes = [8, 8], strides = [1, 1]} : vector<16x32xf32> to vector<8x8xf32>
    %cst_30 = arith.constant 0.353553385 : f32
    %60 = vector.broadcast %cst_30 : f32 to vector<8x8xf32>
    %61 = arith.mulf %59, %60 : vector<8x8xf32>
    %62 = vector.extract_strided_slice %35 {offsets = [0, 8], sizes = [8, 8], strides = [1, 1]} : vector<16x32xf32> to vector<8x8xf32>
    %63 = vector.extract_strided_slice %40 {offsets = [0, 8], sizes = [8, 8], strides = [1, 1]} : vector<16x32xf32> to vector<8x8xf32>
    %64 = tpu.transpose %62, [1, 0] : vector<8x8xf32> -> vector<8x8xf32>
    %cst_31 = arith.constant dense<0.000000e+00> : vector<8x8xf32>
    %65 = tpu.matmul %61, %64, %cst_31 {dimension_numbers = #tpu.dot_dimension_numbers<[1], [0], [0], [1], [0, 0, 1, 1], [], []>} : vector<8x8xf32>, vector<8x8xf32>, vector<8x8xf32> -> vector<8x8xf32>
    %cst_32 = arith.constant dense<0xFF800000> : vector<8xf32>
    %66 = vector.multi_reduction <maximumf>, %65, %cst_32 [1] : vector<8x8xf32> to vector<8xf32>
    %67 = vector.shape_cast %66 : vector<8xf32> to vector<8x1xf32>
    %68 = vector.broadcast %67 : vector<8x1xf32> to vector<8x8xf32>
    %69 = arith.subf %65, %68 : vector<8x8xf32>
    %70 = math.exp %69 : vector<8x8xf32>
    %cst_33 = arith.constant dense<0.000000e+00> : vector<8xf32>
    %71 = vector.multi_reduction <add>, %70, %cst_33 [1] : vector<8x8xf32> to vector<8xf32>
    %72 = vector.shape_cast %71 : vector<8xf32> to vector<8x1xf32>
    %cst_34 = arith.constant dense<0.000000e+00> : vector<8x8xf32>
    %73 = tpu.matmul %70, %63, %cst_34 {dimension_numbers = #tpu.dot_dimension_numbers<[1], [0], [0], [1], [0, 0, 1, 1], [], []>} : vector<8x8xf32>, vector<8x8xf32>, vector<8x8xf32> -> vector<8x8xf32>
    %74 = tpu.reciprocal %72 {approx = true} : vector<8x1xf32> -> vector<8x1xf32>
    %75 = vector.broadcast %74 : vector<8x1xf32> to vector<8x8xf32>
    %76 = arith.mulf %73, %75 : vector<8x8xf32>
    %77 = vector.extract_strided_slice %30 {offsets = [0, 16], sizes = [8, 8], strides = [1, 1]} : vector<16x32xf32> to vector<8x8xf32>
    %cst_35 = arith.constant 0.353553385 : f32
    %78 = vector.broadcast %cst_35 : f32 to vector<8x8xf32>
    %79 = arith.mulf %77, %78 : vector<8x8xf32>
    %80 = vector.extract_strided_slice %35 {offsets = [0, 16], sizes = [8, 8], strides = [1, 1]} : vector<16x32xf32> to vector<8x8xf32>
    %81 = vector.extract_strided_slice %40 {offsets = [0, 16], sizes = [8, 8], strides = [1, 1]} : vector<16x32xf32> to vector<8x8xf32>
    %82 = tpu.transpose %80, [1, 0] : vector<8x8xf32> -> vector<8x8xf32>
    %cst_36 = arith.constant dense<0.000000e+00> : vector<8x8xf32>
    %83 = tpu.matmul %79, %82, %cst_36 {dimension_numbers = #tpu.dot_dimension_numbers<[1], [0], [0], [1], [0, 0, 1, 1], [], []>} : vector<8x8xf32>, vector<8x8xf32>, vector<8x8xf32> -> vector<8x8xf32>
    %cst_37 = arith.constant dense<0xFF800000> : vector<8xf32>
    %84 = vector.multi_reduction <maximumf>, %83, %cst_37 [1] : vector<8x8xf32> to vector<8xf32>
    %85 = vector.shape_cast %84 : vector<8xf32> to vector<8x1xf32>
    %86 = vector.broadcast %85 : vector<8x1xf32> to vector<8x8xf32>
    %87 = arith.subf %83, %86 : vector<8x8xf32>
    %88 = math.exp %87 : vector<8x8xf32>
    %cst_38 = arith.constant dense<0.000000e+00> : vector<8xf32>
    %89 = vector.multi_reduction <add>, %88, %cst_38 [1] : vector<8x8xf32> to vector<8xf32>
    %90 = vector.shape_cast %89 : vector<8xf32> to vector<8x1xf32>
    %cst_39 = arith.constant dense<0.000000e+00> : vector<8x8xf32>
    %91 = tpu.matmul %88, %81, %cst_39 {dimension_numbers = #tpu.dot_dimension_numbers<[1], [0], [0], [1], [0, 0, 1, 1], [], []>} : vector<8x8xf32>, vector<8x8xf32>, vector<8x8xf32> -> vector<8x8xf32>
    %92 = tpu.reciprocal %90 {approx = true} : vector<8x1xf32> -> vector<8x1xf32>
    %93 = vector.broadcast %92 : vector<8x1xf32> to vector<8x8xf32>
    %94 = arith.mulf %91, %93 : vector<8x8xf32>
    %95 = vector.extract_strided_slice %30 {offsets = [0, 24], sizes = [8, 8], strides = [1, 1]} : vector<16x32xf32> to vector<8x8xf32>
    %cst_40 = arith.constant 0.353553385 : f32
    %96 = vector.broadcast %cst_40 : f32 to vector<8x8xf32>
    %97 = arith.mulf %95, %96 : vector<8x8xf32>
    %98 = vector.extract_strided_slice %35 {offsets = [0, 24], sizes = [8, 8], strides = [1, 1]} : vector<16x32xf32> to vector<8x8xf32>
    %99 = vector.extract_strided_slice %40 {offsets = [0, 24], sizes = [8, 8], strides = [1, 1]} : vector<16x32xf32> to vector<8x8xf32>
    %100 = tpu.transpose %98, [1, 0] : vector<8x8xf32> -> vector<8x8xf32>
    %cst_41 = arith.constant dense<0.000000e+00> : vector<8x8xf32>
    %101 = tpu.matmul %97, %100, %cst_41 {dimension_numbers = #tpu.dot_dimension_numbers<[1], [0], [0], [1], [0, 0, 1, 1], [], []>} : vector<8x8xf32>, vector<8x8xf32>, vector<8x8xf32> -> vector<8x8xf32>
    %cst_42 = arith.constant dense<0xFF800000> : vector<8xf32>
    %102 = vector.multi_reduction <maximumf>, %101, %cst_42 [1] : vector<8x8xf32> to vector<8xf32>
    %103 = vector.shape_cast %102 : vector<8xf32> to vector<8x1xf32>
    %104 = vector.broadcast %103 : vector<8x1xf32> to vector<8x8xf32>
    %105 = arith.subf %101, %104 : vector<8x8xf32>
    %106 = math.exp %105 : vector<8x8xf32>
    %cst_43 = arith.constant dense<0.000000e+00> : vector<8xf32>
    %107 = vector.multi_reduction <add>, %106, %cst_43 [1] : vector<8x8xf32> to vector<8xf32>
    %108 = vector.shape_cast %107 : vector<8xf32> to vector<8x1xf32>
    %cst_44 = arith.constant dense<0.000000e+00> : vector<8x8xf32>
    %109 = tpu.matmul %106, %99, %cst_44 {dimension_numbers = #tpu.dot_dimension_numbers<[1], [0], [0], [1], [0, 0, 1, 1], [], []>} : vector<8x8xf32>, vector<8x8xf32>, vector<8x8xf32> -> vector<8x8xf32>
    %110 = tpu.reciprocal %108 {approx = true} : vector<8x1xf32> -> vector<8x1xf32>
    %111 = vector.broadcast %110 : vector<8x1xf32> to vector<8x8xf32>
    %112 = arith.mulf %109, %111 : vector<8x8xf32>
    %113 = tpu.concatenate %58, %76, %94, %112 in 1 : vector<8x8xf32>, vector<8x8xf32>, vector<8x8xf32>, vector<8x8xf32> -> vector<8x32xf32>
    %114 = vector.extract_strided_slice %30 {offsets = [8, 0], sizes = [8, 8], strides = [1, 1]} : vector<16x32xf32> to vector<8x8xf32>
    %cst_45 = arith.constant 0.353553385 : f32
    %115 = vector.broadcast %cst_45 : f32 to vector<8x8xf32>
    %116 = arith.mulf %114, %115 : vector<8x8xf32>
    %117 = vector.extract_strided_slice %35 {offsets = [8, 0], sizes = [8, 8], strides = [1, 1]} : vector<16x32xf32> to vector<8x8xf32>
    %118 = vector.extract_strided_slice %40 {offsets = [8, 0], sizes = [8, 8], strides = [1, 1]} : vector<16x32xf32> to vector<8x8xf32>
    %119 = tpu.transpose %117, [1, 0] : vector<8x8xf32> -> vector<8x8xf32>
    %cst_46 = arith.constant dense<0.000000e+00> : vector<8x8xf32>
    %120 = tpu.matmul %116, %119, %cst_46 {dimension_numbers = #tpu.dot_dimension_numbers<[1], [0], [0], [1], [0, 0, 1, 1], [], []>} : vector<8x8xf32>, vector<8x8xf32>, vector<8x8xf32> -> vector<8x8xf32>
    %cst_47 = arith.constant dense<0xFF800000> : vector<8xf32>
    %121 = vector.multi_reduction <maximumf>, %120, %cst_47 [1] : vector<8x8xf32> to vector<8xf32>
    %122 = vector.shape_cast %121 : vector<8xf32> to vector<8x1xf32>
    %123 = vector.broadcast %122 : vector<8x1xf32> to vector<8x8xf32>
    %124 = arith.subf %120, %123 : vector<8x8xf32>
    %125 = math.exp %124 : vector<8x8xf32>
    %cst_48 = arith.constant dense<0.000000e+00> : vector<8xf32>
    %126 = vector.multi_reduction <add>, %125, %cst_48 [1] : vector<8x8xf32> to vector<8xf32>
    %127 = vector.shape_cast %126 : vector<8xf32> to vector<8x1xf32>
    %cst_49 = arith.constant dense<0.000000e+00> : vector<8x8xf32>
    %128 = tpu.matmul %125, %118, %cst_49 {dimension_numbers = #tpu.dot_dimension_numbers<[1], [0], [0], [1], [0, 0, 1, 1], [], []>} : vector<8x8xf32>, vector<8x8xf32>, vector<8x8xf32> -> vector<8x8xf32>
    %129 = tpu.reciprocal %127 {approx = true} : vector<8x1xf32> -> vector<8x1xf32>
    %130 = vector.broadcast %129 : vector<8x1xf32> to vector<8x8xf32>
    %131 = arith.mulf %128, %130 : vector<8x8xf32>
    %132 = vector.extract_strided_slice %30 {offsets = [8, 8], sizes = [8, 8], strides = [1, 1]} : vector<16x32xf32> to vector<8x8xf32>
    %cst_50 = arith.constant 0.353553385 : f32
    %133 = vector.broadcast %cst_50 : f32 to vector<8x8xf32>
    %134 = arith.mulf %132, %133 : vector<8x8xf32>
    %135 = vector.extract_strided_slice %35 {offsets = [8, 8], sizes = [8, 8], strides = [1, 1]} : vector<16x32xf32> to vector<8x8xf32>
    %136 = vector.extract_strided_slice %40 {offsets = [8, 8], sizes = [8, 8], strides = [1, 1]} : vector<16x32xf32> to vector<8x8xf32>
    %137 = tpu.transpose %135, [1, 0] : vector<8x8xf32> -> vector<8x8xf32>
    %cst_51 = arith.constant dense<0.000000e+00> : vector<8x8xf32>
    %138 = tpu.matmul %134, %137, %cst_51 {dimension_numbers = #tpu.dot_dimension_numbers<[1], [0], [0], [1], [0, 0, 1, 1], [], []>} : vector<8x8xf32>, vector<8x8xf32>, vector<8x8xf32> -> vector<8x8xf32>
    %cst_52 = arith.constant dense<0xFF800000> : vector<8xf32>
    %139 = vector.multi_reduction <maximumf>, %138, %cst_52 [1] : vector<8x8xf32> to vector<8xf32>
    %140 = vector.shape_cast %139 : vector<8xf32> to vector<8x1xf32>
    %141 = vector.broadcast %140 : vector<8x1xf32> to vector<8x8xf32>
    %142 = arith.subf %138, %141 : vector<8x8xf32>
    %143 = math.exp %142 : vector<8x8xf32>
    %cst_53 = arith.constant dense<0.000000e+00> : vector<8xf32>
    %144 = vector.multi_reduction <add>, %143, %cst_53 [1] : vector<8x8xf32> to vector<8xf32>
    %145 = vector.shape_cast %144 : vector<8xf32> to vector<8x1xf32>
    %cst_54 = arith.constant dense<0.000000e+00> : vector<8x8xf32>
    %146 = tpu.matmul %143, %136, %cst_54 {dimension_numbers = #tpu.dot_dimension_numbers<[1], [0], [0], [1], [0, 0, 1, 1], [], []>} : vector<8x8xf32>, vector<8x8xf32>, vector<8x8xf32> -> vector<8x8xf32>
    %147 = tpu.reciprocal %145 {approx = true} : vector<8x1xf32> -> vector<8x1xf32>
    %148 = vector.broadcast %147 : vector<8x1xf32> to vector<8x8xf32>
    %149 = arith.mulf %146, %148 : vector<8x8xf32>
    %150 = vector.extract_strided_slice %30 {offsets = [8, 16], sizes = [8, 8], strides = [1, 1]} : vector<16x32xf32> to vector<8x8xf32>
    %cst_55 = arith.constant 0.353553385 : f32
    %151 = vector.broadcast %cst_55 : f32 to vector<8x8xf32>
    %152 = arith.mulf %150, %151 : vector<8x8xf32>
    %153 = vector.extract_strided_slice %35 {offsets = [8, 16], sizes = [8, 8], strides = [1, 1]} : vector<16x32xf32> to vector<8x8xf32>
    %154 = vector.extract_strided_slice %40 {offsets = [8, 16], sizes = [8, 8], strides = [1, 1]} : vector<16x32xf32> to vector<8x8xf32>
    %155 = tpu.transpose %153, [1, 0] : vector<8x8xf32> -> vector<8x8xf32>
    %cst_56 = arith.constant dense<0.000000e+00> : vector<8x8xf32>
    %156 = tpu.matmul %152, %155, %cst_56 {dimension_numbers = #tpu.dot_dimension_numbers<[1], [0], [0], [1], [0, 0, 1, 1], [], []>} : vector<8x8xf32>, vector<8x8xf32>, vector<8x8xf32> -> vector<8x8xf32>
    %cst_57 = arith.constant dense<0xFF800000> : vector<8xf32>
    %157 = vector.multi_reduction <maximumf>, %156, %cst_57 [1] : vector<8x8xf32> to vector<8xf32>
    %158 = vector.shape_cast %157 : vector<8xf32> to vector<8x1xf32>
    %159 = vector.broadcast %158 : vector<8x1xf32> to vector<8x8xf32>
    %160 = arith.subf %156, %159 : vector<8x8xf32>
    %161 = math.exp %160 : vector<8x8xf32>
    %cst_58 = arith.constant dense<0.000000e+00> : vector<8xf32>
    %162 = vector.multi_reduction <add>, %161, %cst_58 [1] : vector<8x8xf32> to vector<8xf32>
    %163 = vector.shape_cast %162 : vector<8xf32> to vector<8x1xf32>
    %cst_59 = arith.constant dense<0.000000e+00> : vector<8x8xf32>
    %164 = tpu.matmul %161, %154, %cst_59 {dimension_numbers = #tpu.dot_dimension_numbers<[1], [0], [0], [1], [0, 0, 1, 1], [], []>} : vector<8x8xf32>, vector<8x8xf32>, vector<8x8xf32> -> vector<8x8xf32>
    %165 = tpu.reciprocal %163 {approx = true} : vector<8x1xf32> -> vector<8x1xf32>
    %166 = vector.broadcast %165 : vector<8x1xf32> to vector<8x8xf32>
    %167 = arith.mulf %164, %166 : vector<8x8xf32>
    %168 = vector.extract_strided_slice %30 {offsets = [8, 24], sizes = [8, 8], strides = [1, 1]} : vector<16x32xf32> to vector<8x8xf32>
    %cst_60 = arith.constant 0.353553385 : f32
    %169 = vector.broadcast %cst_60 : f32 to vector<8x8xf32>
    %170 = arith.mulf %168, %169 : vector<8x8xf32>
    %171 = vector.extract_strided_slice %35 {offsets = [8, 24], sizes = [8, 8], strides = [1, 1]} : vector<16x32xf32> to vector<8x8xf32>
    %172 = vector.extract_strided_slice %40 {offsets = [8, 24], sizes = [8, 8], strides = [1, 1]} : vector<16x32xf32> to vector<8x8xf32>
    %173 = tpu.transpose %171, [1, 0] : vector<8x8xf32> -> vector<8x8xf32>
    %cst_61 = arith.constant dense<0.000000e+00> : vector<8x8xf32>
    %174 = tpu.matmul %170, %173, %cst_61 {dimension_numbers = #tpu.dot_dimension_numbers<[1], [0], [0], [1], [0, 0, 1, 1], [], []>} : vector<8x8xf32>, vector<8x8xf32>, vector<8x8xf32> -> vector<8x8xf32>
    %cst_62 = arith.constant dense<0xFF800000> : vector<8xf32>
    %175 = vector.multi_reduction <maximumf>, %174, %cst_62 [1] : vector<8x8xf32> to vector<8xf32>
    %176 = vector.shape_cast %175 : vector<8xf32> to vector<8x1xf32>
    %177 = vector.broadcast %176 : vector<8x1xf32> to vector<8x8xf32>
    %178 = arith.subf %174, %177 : vector<8x8xf32>
    %179 = math.exp %178 : vector<8x8xf32>
    %cst_63 = arith.constant dense<0.000000e+00> : vector<8xf32>
    %180 = vector.multi_reduction <add>, %179, %cst_63 [1] : vector<8x8xf32> to vector<8xf32>
    %181 = vector.shape_cast %180 : vector<8xf32> to vector<8x1xf32>
    %cst_64 = arith.constant dense<0.000000e+00> : vector<8x8xf32>
    %182 = tpu.matmul %179, %172, %cst_64 {dimension_numbers = #tpu.dot_dimension_numbers<[1], [0], [0], [1], [0, 0, 1, 1], [], []>} : vector<8x8xf32>, vector<8x8xf32>, vector<8x8xf32> -> vector<8x8xf32>
    %183 = tpu.reciprocal %181 {approx = true} : vector<8x1xf32> -> vector<8x1xf32>
    %184 = vector.broadcast %183 : vector<8x1xf32> to vector<8x8xf32>
    %185 = arith.mulf %182, %184 : vector<8x8xf32>
    %186 = tpu.concatenate %131, %149, %167, %185 in 1 : vector<8x8xf32>, vector<8x8xf32>, vector<8x8xf32>, vector<8x8xf32> -> vector<8x32xf32>
    %187 = tpu.concatenate %113, %186 in 0 : vector<8x32xf32>, vector<8x32xf32> -> vector<16x32xf32>
    %c0_65 = arith.constant 0 : index
    %c0_66 = arith.constant 0 : index
    %188 = vector.load %arg9[%c0_65, %c0_66] : memref<32x32xf32, #tpu.memory_space<vmem>>, vector<32x32xf32>
    %cst_67 = arith.constant dense<0.000000e+00> : vector<16x32xf32>
    %189 = tpu.matmul %187, %188, %cst_67 {dimension_numbers = #tpu.dot_dimension_numbers<[1], [0], [0], [1], [0, 0, 1, 1], [], []>} : vector<16x32xf32>, vector<32x32xf32>, vector<16x32xf32> -> vector<16x32xf32>
    %c0_68 = arith.constant 0 : index
    %c0_69 = arith.constant 0 : index
    %190 = vector.load %arg10[%c0_68, %c0_69] : memref<1x32xf32, #tpu.memory_space<vmem>>, vector<1x32xf32>
    %191 = vector.broadcast %190 : vector<1x32xf32> to vector<16x32xf32>
    %192 = arith.addf %189, %191 : vector<16x32xf32>
    %193 = arith.addf %1, %192 : vector<16x32xf32>
    %c0_70 = arith.constant 0 : index
    %c0_71 = arith.constant 0 : index
    %194 = vector.load %arg11[%c0_70, %c0_71] : memref<1x32xf32, #tpu.memory_space<vmem>>, vector<1x32xf32>
    %c0_72 = arith.constant 0 : index
    %c0_73 = arith.constant 0 : index
    %195 = vector.load %arg12[%c0_72, %c0_73] : memref<1x32xf32, #tpu.memory_space<vmem>>, vector<1x32xf32>
    %cst_74 = arith.constant dense<0.000000e+00> : vector<16xf32>
    %196 = vector.multi_reduction <add>, %193, %cst_74 [1] : vector<16x32xf32> to vector<16xf32>
    %197 = vector.shape_cast %196 : vector<16xf32> to vector<16x1xf32>
    %cst_75 = arith.constant 3.200000e+01 : f32
    %198 = vector.broadcast %cst_75 : f32 to vector<16x1xf32>
    %199 = arith.divf %197, %198 : vector<16x1xf32>
    %200 = vector.broadcast %199 : vector<16x1xf32> to vector<16x32xf32>
    %201 = arith.subf %193, %200 : vector<16x32xf32>
    %202 = arith.mulf %201, %201 : vector<16x32xf32>
    %cst_76 = arith.constant dense<0.000000e+00> : vector<16xf32>
    %203 = vector.multi_reduction <add>, %202, %cst_76 [1] : vector<16x32xf32> to vector<16xf32>
    %204 = vector.shape_cast %203 : vector<16xf32> to vector<16x1xf32>
    %cst_77 = arith.constant 3.200000e+01 : f32
    %205 = vector.broadcast %cst_77 : f32 to vector<16x1xf32>
    %206 = arith.divf %204, %205 : vector<16x1xf32>
    %207 = vector.broadcast %199 : vector<16x1xf32> to vector<16x32xf32>
    %208 = arith.subf %193, %207 : vector<16x32xf32>
    %cst_78 = arith.constant 9.99999974E-6 : f32
    %209 = vector.broadcast %cst_78 : f32 to vector<16x1xf32>
    %210 = arith.addf %206, %209 : vector<16x1xf32>
    %211 = math.rsqrt %210 : vector<16x1xf32>
    %212 = vector.broadcast %211 : vector<16x1xf32> to vector<16x32xf32>
    %213 = arith.mulf %208, %212 : vector<16x32xf32>
    %214 = vector.broadcast %194 : vector<1x32xf32> to vector<16x32xf32>
    %215 = arith.mulf %213, %214 : vector<16x32xf32>
    %216 = vector.broadcast %195 : vector<1x32xf32> to vector<16x32xf32>
    %217 = arith.addf %215, %216 : vector<16x32xf32>
    %c0_79 = arith.constant 0 : index
    %c0_80 = arith.constant 0 : index
    %218 = vector.load %arg13[%c0_79, %c0_80] : memref<32x128xf32, #tpu.memory_space<vmem>>, vector<32x128xf32>
    %cst_81 = arith.constant dense<0.000000e+00> : vector<16x128xf32>
    %219 = tpu.matmul %217, %218, %cst_81 {dimension_numbers = #tpu.dot_dimension_numbers<[1], [0], [0], [1], [0, 0, 1, 1], [], []>} : vector<16x32xf32>, vector<32x128xf32>, vector<16x128xf32> -> vector<16x128xf32>
    %c0_82 = arith.constant 0 : index
    %c0_83 = arith.constant 0 : index
    %220 = vector.load %arg14[%c0_82, %c0_83] : memref<1x128xf32, #tpu.memory_space<vmem>>, vector<1x128xf32>
    %221 = vector.broadcast %220 : vector<1x128xf32> to vector<16x128xf32>
    %222 = arith.addf %219, %221 : vector<16x128xf32>
    %223 = vector.extract_strided_slice %222 {offsets = [0, 0], sizes = [16, 64], strides = [1, 1]} : vector<16x128xf32> to vector<16x64xf32>
    %224 = vector.extract_strided_slice %222 {offsets = [0, 64], sizes = [16, 64], strides = [1, 1]} : vector<16x128xf32> to vector<16x64xf32>
    %225 = arith.negf %223 : vector<16x64xf32>
    %226 = math.exp %225 : vector<16x64xf32>
    %cst_84 = arith.constant 1.000000e+00 : f32
    %227 = vector.broadcast %cst_84 : f32 to vector<16x64xf32>
    %228 = arith.addf %227, %226 : vector<16x64xf32>
    %229 = arith.divf %227, %228 : vector<16x64xf32>
    %230 = arith.mulf %223, %229 : vector<16x64xf32>
    %231 = arith.mulf %230, %224 : vector<16x64xf32>
    %c0_85 = arith.constant 0 : index
    %c0_86 = arith.constant 0 : index
    %232 = vector.load %arg15[%c0_85, %c0_86] : memref<64x32xf32, #tpu.memory_space<vmem>>, vector<64x32xf32>
    %cst_87 = arith.constant dense<0.000000e+00> : vector<16x32xf32>
    %233 = tpu.matmul %231, %232, %cst_87 {dimension_numbers = #tpu.dot_dimension_numbers<[1], [0], [0], [1], [0, 0, 1, 1], [], []>} : vector<16x64xf32>, vector<64x32xf32>, vector<16x32xf32> -> vector<16x32xf32>
    %c0_88 = arith.constant 0 : index
    %c0_89 = arith.constant 0 : index
    %234 = vector.load %arg16[%c0_88, %c0_89] : memref<1x32xf32, #tpu.memory_space<vmem>>, vector<1x32xf32>
    %235 = vector.broadcast %234 : vector<1x32xf32> to vector<16x32xf32>
    %236 = arith.addf %233, %235 : vector<16x32xf32>
    %237 = arith.addf %193, %236 : vector<16x32xf32>
    %238 = vector.shape_cast %237 : vector<16x32xf32> to vector<2x8x32xf32>
    %c0_90 = arith.constant 0 : index
    %c0_91 = arith.constant 0 : index
    %c0_92 = arith.constant 0 : index
    %239 = vector.load %arg17[%c0_90, %c0_91, %c0_92] : memref<2x8x32xf32, #tpu.memory_space<vmem>>, vector<2x8x32xf32>
    tpu.vector_store %arg17[%c0_90, %c0_91, %c0_92], %238 {strides = array<i32>} : memref<2x8x32xf32, #tpu.memory_space<vmem>>, vector<2x8x32xf32>,
    return
  }
}

</mosaic_0001>

<bundles_post_ra>
// kernel: swiglu_attention_block.1
= control target key start
LH: loop header
LB: loop body
LE: loop exit
PB: predicated region body
PF: predicated region fallthrough
CT: control target
= control target key end

     0   :  { %s3162_s0 = inlined_call_operand.hbm [shape: f32[2,8,32], index: 0, kind: input, shape index: {}]   ;;  %s3163_s1 = inlined_call_operand.vmem [shape: f32[1,32], index: 1, kind: input, shape index: {}]   ;;  %s3164_s2 = inlined_call_operand.vmem [shape: f32[1,32], index: 2, kind: input, shape index: {}]   ;;  %s3165_s3 = inlined_call_operand.vmem [shape: f32[32,32], index: 3, kind: input, shape index: {}]   ;;  %s3166_s4 = inlined_call_operand.vmem [shape: f32[1,32], index: 4, kind: input, shape index: {}]   ;;  %s3167_s5 = inlined_call_operand.vmem [shape: f32[32,32], index: 5, kind: input, shape index: {}]   ;;  %s3168_s6 = inlined_call_operand.vmem [shape: f32[1,32], index: 6, kind: input, shape index: {}]   ;;  %s3169_s7 = inlined_call_operand.vmem [shape: f32[32,32], index: 7, kind: input, shape index: {}]   ;;  %s3170_s8 = inlined_call_operand.vmem [shape: f32[1,32], index: 8, kind: input, shape index: {}]   ;;  %s3171_s9 = inlined_call_operand.hbm [shape: f32[32,32], index: 9, kind: input, shape index: {}]   ;;  %s3172_s10 = inlined_call_operand.vmem [shape: f32[1,32], index: 10, kind: input, shape index: {}]   ;;  %s3173_s11 = inlined_call_operand.vmem [shape: f32[1,32], index: 11, kind: input, shape index: {}]   ;;  %s3174_s12 = inlined_call_operand.vmem [shape: f32[1,32], index: 12, kind: input, shape index: {}]   ;;  %s3175_s13 = inlined_call_operand.hbm [shape: f32[32,128], index: 13, kind: input, shape index: {}]   ;;  %s3176_s14 = inlined_call_operand.hbm [shape: f32[1,128], index: 14, kind: input, shape index: {}]   ;;  %s3177_s15 = inlined_call_operand.vmem [shape: f32[64,32], index: 15, kind: input, shape index: {}]   ;;  %s3178_s16 = inlined_call_operand.hbm [shape: f32[1,32], index: 16, kind: input, shape index: {}]   ;;  %s3179_s17 = inlined_call_operand.hbm [shape: f32[2,8,32], index: 17, kind: output, shape index: {}]  }
   0x1   :  { %3183 = sst [smem:[#allocation16_spill]] %s3162_s0 }
   0x2   :  { %3184 = sst [smem:[#allocation17_spill]] %s3163_s1 }
   0x3   :  { %22 = vsyncpa [#allocation3], 0 }
   0x4   :  { %23 = vsyncpa [#allocation6], 0 }
   0x5   :  { %24 = vsyncpa [#allocation9], 0 }
   0x6   :  { %25 = vsyncpa [#allocation4], 0  ;;  %s2688_s24 = smov [#allocation5]   ;;  %s2689_s26 = smov [#allocation8]  }
   0x7   :  { %s59_s25 = sshll.u32 %s2688_s24, 4  ;;  %s90_s27 = sshll.u32 %s2689_s26, 4  ;;  %s60_s25 = int_to_ptr.vmem [resolvable:$true] %s59_s25  ;;  %s2794_s27 = int_to_ptr.vmem [resolvable:$true] %s90_s27 }
   0x8   :  { %s2548_s0 = scalar_lea.hbm %s3171_s9, 512 }
   0x9   :  { %p2549_p0 = scmp.ne.s32.totalorder %s3171_s9, %s2548_s0  ;;  %p2552_p1 = scmp.lt.u32.totalorder %s2548_s0, %s3171_s9 }
   0xb   :  { %p2554_p2 = pnand %p2552_p1, %p2549_p0 }
   0xd   :  { %2557 = shalt.err (!%p2554_p2)
}
   0xe   :  { %s2558_s20 = scalar_lea.vmem %s60_s25, 512  ;;  %p2563_p4 = scmp.lt.s32.totalorder %s60_s25, %s60_s25 }
   0xf   :  { %p2559_p3 = scmp.ne.s32.totalorder %s60_s25, %s2558_s20  ;;  %p2564_p5 = scmp.lt.s32.totalorder %s2558_s20, %s2558_s20 }
  0x11   :  { %p2565_p6 = por %p2564_p5, %p2563_p4 }
  0x13   :  { %p2566_p7 = pnand %p2565_p6, %p2559_p3 }
  0x15   :  { %2569 = shalt.err (!%p2566_p7)
}
  0x16   :  { %s3181_s21 = smov 128   ;;  %s2691_s22 = smov 8  }
  0x17   :  { %65 = dma.hbm_to_vmem [thread:$0]  %s3171_s9, 512, %s60_s25, [#allocation6], %s3181_s21, %s3181_s21, %s2691_s22  }
  0x18   :  { %s2570_s29 = scalar_lea.hbm %s3176_s14, 16 }
  0x19   :  { %p2571_p8 = scmp.ne.s32.totalorder %s3176_s14, %s2570_s29  ;;  %p2574_p9 = scmp.lt.u32.totalorder %s2570_s29, %s3176_s14 }
  0x1b   :  { %p2576_p10 = pnand %p2574_p9, %p2571_p8 }
  0x1d   :  { %2579 = shalt.err (!%p2576_p10)
}
  0x1e   :  { %s2580_s1 = scalar_lea.vmem %s2794_s27, 16  ;;  %s2584_s9 = scalar_lea.vmem %s2794_s27, 32 }
  0x1f   :  { %p2581_p11 = scmp.ne.s32.totalorder %s2794_s27, %s2580_s1  ;;  %p2585_p12 = scmp.lt.s32.totalorder %s2794_s27, %s2794_s27 }
  0x20   :  { %p2586_p13 = scmp.lt.s32.totalorder %s2584_s9, %s2580_s1 }
  0x22   :  { %p2587_p0 = por %p2586_p13, %p2585_p12 }
  0x24   :  { %p2588_p1 = pnand %p2587_p0, %p2581_p11 }
  0x26   :  { %2591 = shalt.err (!%p2588_p1)
}
  0x27   :  { %93 = dma.hbm_to_vmem [thread:$0]  %s3176_s14, 16, %s2794_s27, [#allocation9]  }
  0x28   :  { %s2692_s23 = smov [#allocation2]   ;;  %s2693_s26 = smov [#allocation7]  }
  0x29   :  { %s31_s24 = sshll.u32 %s2692_s23, 4  ;;  %s77_s28 = sshll.u32 %s2693_s26, 4  ;;  %s32_s24 = int_to_ptr.vmem [resolvable:$true] %s31_s24  ;;  %s2829_s28 = int_to_ptr.vmem [resolvable:$true] %s77_s28 }
  0x2a   :  { %s3185_s30 = sld [smem:[#allocation16_spill]] }
  0x30   :  { %s2592_s18 = scalar_lea.hbm %s3185_s30, 256 }
  0x31   :  { %p2593_p2 = scmp.ne.s32.totalorder %s3185_s30, %s2592_s18  ;;  %p2596_p3 = scmp.lt.u32.totalorder %s2592_s18, %s3185_s30 }
  0x33   :  { %p2598_p4 = pnand %p2596_p3, %p2593_p2 }
  0x35   :  { %2601 = shalt.err (!%p2598_p4)
}
  0x36   :  { %s2602_s14 = scalar_lea.vmem %s32_s24, 256  ;;  %p2607_p6 = scmp.lt.s32.totalorder %s32_s24, %s32_s24 }
  0x37   :  { %p2603_p5 = scmp.ne.s32.totalorder %s32_s24, %s2602_s14  ;;  %p2608_p7 = scmp.lt.s32.totalorder %s2602_s14, %s2602_s14 }
  0x39   :  { %p2609_p8 = por %p2608_p7, %p2607_p6 }
  0x3b   :  { %p2610_p9 = pnand %p2609_p8, %p2603_p5 }
  0x3d   :  { %2613 = shalt.err (!%p2610_p9)
}
  0x3e   :  { %s3186_s27 = smov 128   ;;  %s2614_s21 = scalar_lea.hbm %s3175_s13, 512 }
  0x3f   :  { %37 = dma.hbm_to_vmem [thread:$0]  %s3185_s30, 256, %s32_s24, [#allocation3], %s3186_s27, %s3186_s27, %s2691_s22  }
  0x40   :  { %p2615_p10 = scmp.ne.s32.totalorder %s3175_s13, %s2614_s21  ;;  %p2618_p11 = scmp.lt.u32.totalorder %s2614_s21, %s3175_s13 }
  0x42   :  { %p2620_p12 = pnand %p2618_p11, %p2615_p10 }
  0x44   :  { %2623 = shalt.err (!%p2620_p12)
}
  0x45   :  { %s2624_s1 = scalar_lea.vmem %s2829_s28, 512  ;;  %p2629_p0 = scmp.lt.s32.totalorder %s2829_s28, %s2829_s28 }
  0x46   :  { %p2625_p13 = scmp.ne.s32.totalorder %s2829_s28, %s2624_s1  ;;  %p2630_p1 = scmp.lt.s32.totalorder %s2624_s1, %s2624_s1 }
  0x48   :  { %p2631_p2 = por %p2630_p1, %p2629_p0 }
  0x4a   :  { %p2632_p3 = pnand %p2631_p2, %p2625_p13 }
  0x4c   :  { %2635 = shalt.err (!%p2632_p3)
}
  0x4d   :  { %83 = dma.hbm_to_vmem [thread:$0]  %s3175_s13, 512, %s2829_s28, [#allocation6], %s3186_s27, %s3186_s27, %s2691_s22  }
  0x4e   :  { %s2694_s9 = smov [#allocation10]   ;;  %s2636_s23 = scalar_lea.hbm %s3178_s16, 16 }
  0x4f   :  { %s102_s14 = sshll.u32 %s2694_s9, 4  ;;  %p2637_p4 = scmp.ne.s32.totalorder %s3178_s16, %s2636_s23  ;;  %s103_s14 = int_to_ptr.vmem [resolvable:$true] %s102_s14 }
  0x50   :  { %p2640_p5 = scmp.lt.u32.totalorder %s2636_s23, %s3178_s16 }
  0x52   :  { %p2642_p6 = pnand %p2640_p5, %p2637_p4 }
  0x54   :  { %2645 = shalt.err (!%p2642_p6)
}
  0x55   :  { %s2646_s18 = scalar_lea.vmem %s103_s14, 16  ;;  %s2650_s13 = scalar_lea.vmem %s103_s14, 32 }
  0x56   :  { %p2647_p7 = scmp.ne.s32.totalorder %s103_s14, %s2646_s18  ;;  %p2651_p8 = scmp.lt.s32.totalorder %s103_s14, %s103_s14 }
  0x57   :  { %p2652_p9 = scmp.lt.s32.totalorder %s2650_s13, %s2646_s18 }
  0x59   :  { %p2653_p10 = por %p2652_p9, %p2651_p8 }
  0x5b   :  { %p2654_p11 = pnand %p2653_p10, %p2647_p7 }
  0x5d   :  { %2657 = shalt.err (!%p2654_p11)
}
  0x5e   :  { %105 = dma.hbm_to_vmem [thread:$0]  %s3178_s16, 16, %s103_s14, [#allocation9]  }
  0x5f   :  { %2680 = dma.done.wait [#allocation3], 256  }
  0x60   :  { %2681 = vsyncadd [#allocation3], 4294967040 }
  0x61   :  { %2682 = dma.done.wait [#allocation6], 1024  }
  0x62   :  { %2683 = vsyncadd [#allocation6], 4294966272 }
  0x63   :  { %2684 = dma.done.wait [#allocation9], 32  }
  0x64   :  { %2685 = vsyncadd [#allocation9], 4294967264  ;;  %vm125_vm0 = vcmask 261120   ;;  %v2878_v0 = vld [vmem:[#allocation2] sm:$0xff]  ;;  %v2880_v1 = vld [vmem:[#allocation2 + $0x8] sm:$0xff]  ;;  %s3187_s30 = sld [smem:[#allocation17_spill]] }
  0x65   :  { %v126_v2 = vsel %vm125_vm0, %v2878_v0, 0.0  ;;  %v129_v3 = vsel %vm125_vm0, %v2880_v1, 0.0  ;;  %v169_v14 = vld [vmem:[%s3165_s3] sm:$0xff]  ;;  %v170_v15 = vld [vmem:[%s3165_s3 + $0x8] sm:$0xff]  ;;  %v171_v19 = vld [vmem:[%s3165_s3 + $0x10] sm:$0xff]  ;;  %v2695_v48 = vmov 0.0  }
  0x66   :  { %127 = vadd.xlane.f32.xlu0 %v126_v2  ;;  %v347_v16 = vld [vmem:[%s3169_s7] sm:$0xff]  ;;  %v2428_v17 = vpack.c.bf16 %v170_v15, %v169_v14  ;;  %v348_v18 = vld [vmem:[%s3169_s7 + $0x8] sm:$0xff]  ;;  %v172_v20 = vld [vmem:[%s3165_s3 + $0x18] sm:$0xff]  ;;  %vm2696_vm1 = vmmov 0   ;;  %s2697_s0 = smov 120   ;;  %vm434_vm2 = vcmask 64512  }
  0x67   :  { %v2444_v21 = vpack.c.bf16 %v348_v18, %v347_v16  ;;  %v2432_v22 = vpack.c.bf16 %v172_v20, %v171_v19  ;;  %v349_v23 = vld [vmem:[%s3169_s7 + $0x10] sm:$0xff]  ;;  %v350_v24 = vld [vmem:[%s3169_s7 + $0x18] sm:$0xff]  ;;  %v261_v26 = vld [vmem:[%s3167_s5] sm:$0xff]  ;;  %s2701_s28 = smov 24   ;;  %vm1104_vm3 = vcmask 130048   ;;  %vm1106_vm4 = vcmask 195584  }
  0x68   :  { %2429 = vmatprep.subr.bf16.mxu1 %v2428_v17  ;;  %v2448_v25 = vpack.c.bf16 %v350_v24, %v349_v23  ;;  %v262_v27 = vld [vmem:[%s3167_s5 + $0x8] sm:$0xff]  ;;  %v2155_v38 = vld [vmem:[%s3164_s2] ss:$0 sm:$0xff]  ;;  %v263_v43 = vld [vmem:[%s3167_s5 + $0x10] sm:$0xff]  ;;  %s2702_s13 = smov 64   ;;  %vm2049_vm5 = vcmask 523264  }
  0x69   :  { %2431 = vmatpush3.bf16.msra.mxu1 %v2428_v17  ;;  %2445 = vmatprep.subr.bf16.mxu0 %v2444_v21  ;;  %v2436_v28 = vpack.c.bf16 %v262_v27, %v261_v26  ;;  %v264_v44 = vld [vmem:[%s3167_s5 + $0x18] sm:$0xff]  ;;  %v2162_v49 = vld [vmem:[%s3170_s8] ss:$0 sm:$0xff]  ;;  %s2699_s8 = smov 104  }
  0x6a   :  { %130 = vadd.xlane.f32.xlu0 %v129_v3  ;;  %2447 = vmatpush3.bf16.msra.mxu0 %v2444_v21  ;;  %v2154_v36 = vld [vmem:[%s3187_s30] ss:$0 sm:$0xff]  ;;  %v2440_v47 = vpack.c.bf16 %v264_v44, %v263_v43 }
  0x6b   :  { %2433 = vmatprep.subr.bf16.mxu1 %v2432_v22  ;;  %2449 = vmatprep.subr.bf16.mxu0 %v2448_v25  ;;  %v2156_v50 = vld [vmem:[%s3166_s4] ss:$0 sm:$0xff]  ;;  %s2698_s4 = smov 112  }
  0x6c   :  { %v2159_v58 = vld [vmem:[%s3168_s6] ss:$0 sm:$0xff]  ;;  %s2700_s6 = smov 16  }
  0x6d   :  { %2435 = vmatpush3.bf16.msra.mxu1 %v2432_v22 }
  0x6e   :  { %2451 = vmatpush3.bf16.msra.mxu0 %v2448_v25  ;;  %2437 = vmatprep.subr.bf16.mxu1 %v2436_v28 }
  0x6f   :  { %2317 = vmatprep.subr.mxu0 %v2695_v48 }
  0xf3   :  { %v128_v4 = vpop.xlane.xlu0 %127 }
  0xf4   :  { %v133_v5 = vmul.f32 0.03125, %v128_v4 }
  0xf6   :  { %v135_v6 = vsub.f32 %v2878_v0, %v133_v5 }
  0xf7   :  { %v131_v7 = vpop.xlane.xlu0 %130 }
  0xf8   :  { %v134_v8 = vmul.f32 0.03125, %v131_v7  ;;  %v137_v9 = vmul.f32 %v135_v6, %v135_v6 }
  0xfa   :  { %v136_v10 = vsub.f32 %v2880_v1, %v134_v8  ;;  %v139_v11 = vsel %vm125_vm0, %v137_v9, 0.0 }
  0xfb   :  { %140 = vadd.xlane.f32.xlu1 %v139_v11 }
  0xfc   :  { %v138_v12 = vmul.f32 %v136_v10, %v136_v10 }
  0xfe   :  { %v142_v13 = vsel %vm125_vm0, %v138_v12, 0.0 }
  0xff   :  { %143 = vadd.xlane.f32.xlu1 %v142_v13 }
 0x188   :  { %v141_v29 = vpop.xlane.xlu1 %140 }
 0x189   :  { %v145_v30 = vmul.f32 0.03125, %v141_v29 }
 0x18b   :  { %v147_v31 = vadd.f32 1e-05, %v145_v30 }
 0x18c   :  { %v144_v32 = vpop.xlane.xlu1 %143 }
 0x18d   :  { %2500 = vrsqrt.f32 %v147_v31  ;;  %v146_v33 = vmul.f32 0.03125, %v144_v32 }
 0x18f   :  { %v148_v34 = vadd.f32 1e-05, %v146_v33 }
 0x191   :  { %2502 = vrsqrt.f32 %v148_v34 }
 0x197   :  { %v2501_v35 = vpop.eup %2500 }
 0x198   :  { %v151_v37 = vmul.f32 %v2501_v35, %v135_v6 }
 0x19a   :  { %v159_v39 = vmul.f32 %v2154_v36, %v151_v37 }
 0x19b   :  { %v2503_v40 = vpop.eup %2502 }
 0x19c   :  { %v152_v41 = vmul.f32 %v2503_v40, %v136_v10  ;;  %v167_v42 = vadd.f32 %v2155_v38, %v159_v39 }
 0x19e   :  { %v160_v45 = vmul.f32 %v2154_v36, %v152_v41  ;;  %2282 = vmatprep.mubr.msk.f32.mxu1 %vm125_vm0, %v167_v42  ;;  %2304 = vmatprep.mubr.msk.f32.mxu0 %vm125_vm0, %v167_v42 }
 0x1a0   :  { %v168_v46 = vadd.f32 %v2155_v38, %v160_v45 }
 0x1a2   :  { %2283 = vmatmul.mubr.msk.f32.vlgmr.msra.gmra.mrb[0].mxu1 %vm125_vm0, %v168_v46  ;;  %2305 = vmatmul.mubr.msk.f32.vlgmr.msra.gmra.mrb[0].mxu0 %vm125_vm0, %v168_v46 }
 0x1a3   :  { %2439 = vmatpush3.bf16.msra.mxu1 %v2436_v28  ;;  %2293 = vmatprep.mubr.msk.f32.mxu1 %vm125_vm0, %v167_v42 }
 0x1a4   :  { %2441 = vmatprep.subr.bf16.mxu1 %v2440_v47  ;;  %2319 = vmatprep.mubr.msk.f32.mxu0 %vm2696_vm1, %v2695_v48 }
 0x1a7   :  { %2443 = vmatpush3.bf16.msra.mxu1 %v2440_v47 }
 0x1a8   :  { %2307 = vmatprep.subr.mxu1 %v2695_v48 }
 0x1aa   :  { %2294 = vmatmul.mubr.msk.f32.vlgmr.msra.gmra.mrb[2].mxu1 %vm125_vm0, %v168_v46 }
 0x1ab   :  { %2309 = vmatprep.mubr.msk.f32.mxu1 %vm2696_vm1, %v2695_v48 }
 0x275   :  { %v2284_v51 = vpop.f32.mrb[0].mxu1  ;;  %v2306_v52 = vpop.f32.mrb[0].mxu0 }
 0x276   :  { %v2950_v53 = vadd.f32 %v2306_v52, %v2162_v49  ;;  %v252_v54 = vpop.f32.mrb[1].mxu1  ;;  %v424_v55 = vpop.f32.mrb[1].mxu0  ;;  %v258_v2 = vadd.f32 %v2284_v51, %v2156_v50 }
 0x277   :  { %v253_v56 = vadd.f32 %v2156_v50, %v252_v54  ;;  %v2960_v62 = vadd.f32 %v2162_v49, %v424_v55 }
 0x278   :  { %v1108_v3 = vmul.f32 0.35355338, %v258_v2 }
 0x279   :  { %v433_v57 = vmul.f32 0.35355338, %v253_v56 }
 0x27b   :  { %595 = vrot.lane.b32.xlu1 %v433_v57, %s2697_s0 }
 0x27d   :  { %v2295_v59 = vpop.f32.mrb[2].mxu1 }
 0x27e   :  { %v338_v60 = vpop.f32.mrb[3].mxu1  ;;  %v344_v63 = vadd.f32 %v2295_v59, %v2159_v58 }
 0x27f   :  { %v339_v61 = vadd.f32 %v2159_v58, %v338_v60 }
 0x281   :  { %597 = vrot.lane.b32.xlu0 %v339_v61, %s2697_s0  ;;  %2308 = vmatpush3.xpose.msk.msra.mxu1 %vm434_vm2, %v339_v61 }
 0x282   :  { %763 = vrot.lane.b32.xlu1 %v339_v61, %s2698_s4  ;;  %2312 = vmatprep.subr.mxu1 %v2695_v48 }
 0x284   :  { %2310 = vmatmul.mubr.msk.f32.vlgmr.msra.gmra.mrb[4].mxu1 %vm434_vm2, %v433_v57 }
 0x285   :  { %928 = vrot.lane.b32.xlu0 %v339_v61, %s2699_s8  ;;  %2313 = vmatpush3.msra.mxu1 %v2960_v62 }
 0x286   :  { %761 = vrot.lane.b32.xlu1 %v433_v57, %s2698_s4  ;;  %2314 = vmatprep.mubr.msk.f32.mxu1 %vm2696_vm1, %v2695_v48 }
 0x287   :  { %2322 = vmatprep.subr.mxu1 %v2695_v48 }
 0x289   :  { %1271 = vrot.lane.b32.xlu0 %v344_v63, %s2697_s0 }
 0x28a   :  { %926 = vrot.lane.b32.xlu1 %v433_v57, %s2699_s8 }
 0x28d   :  { %1437 = vrot.lane.b32.xlu0 %v344_v63, %s2698_s4 }
 0x28e   :  { %1269 = vrot.lane.b32.xlu1 %v1108_v3, %s2697_s0 }
 0x291   :  { %1602 = vrot.lane.b32.xlu0 %v344_v63, %s2699_s8 }
 0x292   :  { %1435 = vrot.lane.b32.xlu1 %v1108_v3, %s2698_s4 }
 0x296   :  { %1600 = vrot.lane.b32.xlu1 %v1108_v3, %s2699_s8 }
 0x2ed   :  { %v596_v4 = vpop.permute.xlu1 %595 }
 0x2f3   :  { %v598_v5 = vpop.permute.xlu0 %597 }
 0x2f4   :  { %v764_v6 = vpop.permute.xlu1 %763  ;;  %2318 = vmatpush3.xpose.msk.msra.mxu0 %vm434_vm2, %v598_v5 }
 0x2f5   :  { %2327 = vmatprep.subr.mxu0 %v2695_v48 }
 0x2f7   :  { %2320 = vmatmul.mubr.msk.f32.vlgmr.msra.gmra.mrb[2].mxu0 %vm434_vm2, %v596_v4  ;;  %v929_v8 = vpop.permute.xlu0 %928 }
 0x2f8   :  { %v762_v7 = vpop.permute.xlu1 %761  ;;  %2328 = vmatpush3.xpose.msk.msra.mxu0 %vm434_vm2, %v764_v6  ;;  %2329 = vmatprep.mubr.msk.f32.mxu0 %vm2696_vm1, %v2695_v48 }
 0x2f9   :  { %2337 = vmatprep.subr.mxu0 %v2695_v48 }
 0x2fb   :  { %2330 = vmatmul.mubr.msk.f32.vlgmr.msra.gmra.mrb[4].mxu0 %vm434_vm2, %v762_v7  ;;  %v1272_v10 = vpop.permute.xlu0 %1271 }
 0x2fc   :  { %v927_v9 = vpop.permute.xlu1 %926  ;;  %2338 = vmatpush3.xpose.msk.msra.mxu0 %vm434_vm2, %v929_v8  ;;  %2339 = vmatprep.mubr.msk.f32.mxu0 %vm2696_vm1, %v2695_v48 }
 0x2fd   :  { %2347 = vmatprep.subr.mxu0 %v2695_v48 }
 0x2ff   :  { %2340 = vmatmul.mubr.msk.f32.vlgmr.msra.gmra.mrb[6].mxu0 %vm434_vm2, %v927_v9  ;;  %v1438_v12 = vpop.permute.xlu0 %1437 }
 0x300   :  { %2348 = vmatpush3.xpose.msk.msra.mxu0 %vm434_vm2, %v344_v63  ;;  %2349 = vmatprep.mubr.msk.f32.mxu0 %vm2696_vm1, %v2695_v48  ;;  %v1270_v11 = vpop.permute.xlu1 %1269 }
 0x301   :  { %2357 = vmatprep.subr.mxu0 %v2695_v48 }
 0x303   :  { %2350 = vmatmul.mubr.msk.f32.vlgmr.msra.gmra.mrb[8].mxu0 %vm434_vm2, %v1108_v3  ;;  %v1603_v14 = vpop.permute.xlu0 %1602 }
 0x304   :  { %2358 = vmatpush3.xpose.msk.msra.mxu0 %vm434_vm2, %v1272_v10  ;;  %2359 = vmatprep.mubr.msk.f32.mxu0 %vm2696_vm1, %v2695_v48  ;;  %v1436_v13 = vpop.permute.xlu1 %1435 }
 0x305   :  { %2367 = vmatprep.subr.mxu0 %v2695_v48 }
 0x307   :  { %2360 = vmatmul.mubr.msk.f32.vlgmr.msra.gmra.mrb[10].mxu0 %vm434_vm2, %v1270_v11 }
 0x308   :  { %2368 = vmatpush3.xpose.msk.msra.mxu0 %vm434_vm2, %v1438_v12  ;;  %2369 = vmatprep.mubr.msk.f32.mxu0 %vm2696_vm1, %v2695_v48  ;;  %v1601_v15 = vpop.permute.xlu1 %1600 }
 0x309   :  { %2377 = vmatprep.subr.mxu0 %v2695_v48 }
 0x30b   :  { %2370 = vmatmul.mubr.msk.f32.vlgmr.msra.gmra.mrb[12].mxu0 %vm434_vm2, %v1436_v13 }
 0x30c   :  { %2378 = vmatpush3.xpose.msk.msra.mxu0 %vm434_vm2, %v1603_v14  ;;  %2379 = vmatprep.mubr.msk.f32.mxu0 %vm2696_vm1, %v2695_v48 }
 0x30f   :  { %2380 = vmatmul.mubr.msk.f32.vlgmr.msra.gmra.mrb[14].mxu0 %vm434_vm2, %v1601_v15 }
 0x357   :  { %v507_v16 = vpop.f32.mrb[4].mxu1 }
 0x358   :  { %v2311_v17 = vpop.f32.mrb[5].mxu1  ;;  %v511_v18 = vsel %vm434_vm2, %v507_v16, -inf }
 0x359   :  { %512 = vmax.xlane.f32.xlu0 %v511_v18 }
 0x3ca   :  { %v669_v19 = vpop.f32.mrb[2].mxu0 }
 0x3cb   :  { %v2321_v20 = vpop.f32.mrb[3].mxu0  ;;  %v673_v21 = vsel %vm434_vm2, %v669_v19, -inf }
 0x3cc   :  { %674 = vmax.xlane.f32.xlu1 %v673_v21 }
 0x3ce   :  { %v835_v22 = vpop.f32.mrb[4].mxu0 }
 0x3cf   :  { %v2331_v23 = vpop.f32.mrb[5].mxu0  ;;  %v839_v24 = vsel %vm434_vm2, %v835_v22, -inf }
 0x3d0   :  { %840 = vmax.xlane.f32.xlu0 %v839_v24 }
 0x3d2   :  { %v1000_v25 = vpop.f32.mrb[6].mxu0 }
 0x3d3   :  { %v2341_v26 = vpop.f32.mrb[7].mxu0  ;;  %v1004_v27 = vsel %vm434_vm2, %v1000_v25, -inf }
 0x3d4   :  { %1005 = vmax.xlane.f32.xlu0 %v1004_v27 }
 0x3d6   :  { %v1181_v28 = vpop.f32.mrb[8].mxu0 }
 0x3d7   :  { %v2351_v29 = vpop.f32.mrb[9].mxu0  ;;  %v1185_v30 = vsel %vm434_vm2, %v1181_v28, -inf }
 0x3d8   :  { %1186 = vmax.xlane.f32.xlu0 %v1185_v30 }
 0x3da   :  { %v3013_v31 = vpop.f32.mrb[10].mxu0 }
 0x3db   :  { %v2361_v32 = vpop.f32.mrb[11].mxu0  ;;  %v1347_v41 = vsel %vm434_vm2, %v3013_v31, -inf }
 0x3dd   :  { %848 = vrot.lane.b32.xlu1 %v2960_v62, %s2698_s4 }
 0x3de   :  { %v3017_v33 = vpop.f32.mrb[12].mxu0 }
 0x3df   :  { %v2371_v34 = vpop.f32.mrb[13].mxu0  ;;  %v1513_v43 = vsel %vm434_vm2, %v3017_v33, -inf }
 0x3e1   :  { %1013 = vrot.lane.b32.xlu1 %v2960_v62, %s2699_s8 }
 0x3e2   :  { %v3021_v35 = vpop.f32.mrb[14].mxu0 }
 0x3e3   :  { %v2381_v36 = vpop.f32.mrb[15].mxu0  ;;  %v1678_v42 = vsel %vm434_vm2, %v3021_v35, -inf }
 0x3e5   :  { %1357 = vrot.lane.b32.xlu1 %v2950_v53, %s2697_s0 }
 0x3e6   :  { %v513_v37 = vpop.xlane.xlu0 %512 }
 0x3e7   :  { %v514_v38 = vsub.f32 %v507_v16, %v513_v37 }
 0x3e9   :  { %v515_v39 = vmul.f32 1.442695, %v514_v38 }
 0x3eb   :  { %2504 = vpow2.f32 %v515_v39 }
 0x3ee   :  { %683 = vrot.lane.b32.xlu0 %v2960_v62, %s2697_s0 }
 0x3f5   :  { %v3027_v40 = vpop.eup %2504 }
 0x3f6   :  { %2315 = vmatmul.mubr.msk.f32.vlgmr.msra.gmra.mrb[6].mxu1 %vm434_vm2, %v3027_v40  ;;  %v517_v24 = vsel %vm434_vm2, %v3027_v40, 0.0 }
 0x3f7   :  { %2324 = vmatprep.mubr.msk.f32.mxu1 %vm2696_vm1, %v2695_v48 }
 0x409   :  { %1348 = vmax.xlane.f32.xlu1 %v1347_v41 }
 0x40d   :  { %1679 = vmax.xlane.f32.xlu1 %v1678_v42  ;;  %1514 = vmax.xlane.f32.xlu0 %v1513_v43 }
 0x41e   :  { %1687 = vrot.lane.b32.xlu1 %v2950_v53, %s2699_s8 }
 0x423   :  { %1522 = vrot.lane.b32.xlu0 %v2950_v53, %s2698_s4 }
 0x459   :  { %v675_v44 = vpop.xlane.xlu1 %674 }
 0x45a   :  { %v676_v45 = vsub.f32 %v669_v19, %v675_v44  ;;  %v1780_v44 = vld [vmem:[#allocation5] sm:$0xff] }
 0x45c   :  { %v677_v46 = vmul.f32 1.442695, %v676_v45  ;;  %v1781_v45 = vld [vmem:[#allocation5 + $0x8] sm:$0xff] }
 0x45d   :  { %v841_v47 = vpop.xlane.xlu0 %840  ;;  %v849_v59 = vpop.permute.xlu1 %848 }
 0x45e   :  { %2506 = vpow2.f32 %v677_v46  ;;  %v842_v49 = vsub.f32 %v835_v22, %v841_v47  ;;  %v2452_v46 = vpack.c.bf16 %v1781_v45, %v1780_v44 }
 0x460   :  { %v843_v50 = vmul.f32 1.442695, %v842_v49  ;;  %2453 = vmatprep.subr.bf16.mxu0 %v2452_v46  ;;  %v1782_v49 = vld [vmem:[#allocation5 + $0x10] sm:$0xff] }
 0x461   :  { %v1006_v51 = vpop.xlane.xlu0 %1005  ;;  %v1014_v2 = vpop.permute.xlu1 %1013  ;;  %2455 = vmatpush3.bf16.msra.mxu0 %v2452_v46 }
 0x462   :  { %2508 = vpow2.f32 %v843_v50  ;;  %v1007_v52 = vsub.f32 %v1000_v25, %v1006_v51  ;;  %v1783_v50 = vld [vmem:[#allocation5 + $0x18] sm:$0xff] }
 0x463   :  { %v2456_v51 = vpack.c.bf16 %v1783_v50, %v1782_v49 }
 0x464   :  { %v1008_v54 = vmul.f32 1.442695, %v1007_v52 }
 0x465   :  { %v1187_v55 = vpop.xlane.xlu0 %1186  ;;  %v1358_v6 = vpop.permute.xlu1 %1357  ;;  %2457 = vmatprep.subr.bf16.mxu0 %v2456_v51 }
 0x466   :  { %2510 = vpow2.f32 %v1008_v54  ;;  %v1188_v56 = vsub.f32 %v1181_v28, %v1187_v55  ;;  %2459 = vmatpush3.bf16.msra.mxu0 %v2456_v51  ;;  %v2192_v51 = vld [vmem:[%s3173_s11] ss:$0 sm:$0xff] }
 0x468   :  { %v2507_v57 = vpop.eup %2506  ;;  %v1189_v58 = vmul.f32 1.442695, %v1188_v56 }
 0x469   :  { %v684_v60 = vpop.permute.xlu0 %683  ;;  %v679_v61 = vsel %vm434_vm2, %v2507_v57, 0.0 }
 0x46a   :  { %680 = vadd.xlane.f32.xlu0 %v679_v61  ;;  %2323 = vmatpush3.msra.mxu1 %v684_v60  ;;  %2512 = vpow2.f32 %v1189_v58 }
 0x46b   :  { %2325 = vmatmul.mubr.msk.f32.vlgmr.msra.gmra.mrb[8].mxu1 %vm434_vm2, %v2507_v57  ;;  %2332 = vmatprep.subr.mxu1 %v2695_v48 }
 0x46c   :  { %v2509_v62 = vpop.eup %2508  ;;  %2333 = vmatpush3.msra.mxu1 %v849_v59  ;;  %2334 = vmatprep.mubr.msk.f32.mxu1 %vm2696_vm1, %v2695_v48 }
 0x46d   :  { %v845_v63 = vsel %vm434_vm2, %v2509_v62, 0.0  ;;  %2342 = vmatprep.subr.mxu1 %v2695_v48 }
 0x46e   :  { %846 = vadd.xlane.f32.xlu1 %v845_v63 }
 0x46f   :  { %2335 = vmatmul.mubr.msk.f32.vlgmr.msra.gmra.mrb[10].mxu1 %vm434_vm2, %v2509_v62 }
 0x470   :  { %v2511_v3 = vpop.eup %2510  ;;  %2343 = vmatpush3.msra.mxu1 %v1014_v2  ;;  %2344 = vmatprep.mubr.msk.f32.mxu1 %vm2696_vm1, %v2695_v48 }
 0x471   :  { %v1010_v4 = vsel %vm434_vm2, %v2511_v3, 0.0  ;;  %2352 = vmatprep.subr.mxu1 %v2695_v48 }
 0x472   :  { %1011 = vadd.xlane.f32.xlu0 %v1010_v4 }
 0x473   :  { %2345 = vmatmul.mubr.msk.f32.vlgmr.msra.gmra.mrb[12].mxu1 %vm434_vm2, %v2511_v3 }
 0x474   :  { %2353 = vmatpush3.msra.mxu1 %v2950_v53  ;;  %2354 = vmatprep.mubr.msk.f32.mxu1 %vm2696_vm1, %v2695_v48  ;;  %v2513_v5 = vpop.eup %2512 }
 0x475   :  { %2362 = vmatprep.subr.mxu1 %v2695_v48  ;;  %v1191_v23 = vsel %vm434_vm2, %v2513_v5, 0.0 }
 0x477   :  { %2355 = vmatmul.mubr.msk.f32.vlgmr.msra.gmra.mrb[14].mxu1 %vm434_vm2, %v2513_v5 }
 0x478   :  { %2363 = vmatpush3.msra.mxu1 %v1358_v6  ;;  %2364 = vmatprep.mubr.msk.f32.mxu1 %vm2696_vm1, %v2695_v48 }
 0x479   :  { %2372 = vmatprep.subr.mxu1 %v2695_v48 }
 0x496   :  { %v1349_v7 = vpop.xlane.xlu1 %1348 }
 0x497   :  { %v1350_v8 = vsub.f32 %v3013_v31, %v1349_v7 }
 0x499   :  { %v1351_v9 = vmul.f32 1.442695, %v1350_v8 }
 0x49a   :  { %v1680_v53 = vpop.xlane.xlu1 %1679  ;;  %v1515_v10 = vpop.xlane.xlu0 %1514 }
 0x49b   :  { %2514 = vpow2.f32 %v1351_v9  ;;  %v1681_v11 = vsub.f32 %v3021_v35, %v1680_v53  ;;  %v1516_v12 = vsub.f32 %v3017_v33, %v1515_v10 }
 0x49d   :  { %v1682_v13 = vmul.f32 1.442695, %v1681_v11  ;;  %v1517_v14 = vmul.f32 1.442695, %v1516_v12 }
 0x49e   :  { %v1523_v16 = vpop.permute.xlu0 %1522  ;;  %v1688_v21 = vpop.permute.xlu1 %1687 }
 0x49f   :  { %2516 = vpow2.f32 %v1682_v13 }
 0x4a0   :  { %2518 = vpow2.f32 %v1517_v14 }
 0x4a5   :  { %v2515_v15 = vpop.eup %2514 }
 0x4a6   :  { %2365 = vmatmul.mubr.msk.f32.vlgmr.msra.gmra.mrb[16].mxu1 %vm434_vm2, %v2515_v15  ;;  %v1353_v17 = vsel %vm434_vm2, %v2515_v15, 0.0 }
 0x4a7   :  { %2373 = vmatpush3.msra.mxu1 %v1523_v16  ;;  %1354 = vadd.xlane.f32.xlu0 %v1353_v17 }
 0x4a8   :  { %2374 = vmatprep.mubr.msk.f32.mxu1 %vm2696_vm1, %v2695_v48  ;;  %2382 = vmatprep.subr.mxu1 %v2695_v48 }
 0x4a9   :  { %v2517_v18 = vpop.eup %2516 }
 0x4aa   :  { %v2519_v19 = vpop.eup %2518  ;;  %v1684_v20 = vsel %vm434_vm2, %v2517_v18, 0.0 }
 0x4ab   :  { %2375 = vmatmul.mubr.msk.f32.vlgmr.msra.gmra.mrb[18].mxu1 %vm434_vm2, %v2519_v19  ;;  %1685 = vadd.xlane.f32.xlu1 %v1684_v20  ;;  %v1519_v22 = vsel %vm434_vm2, %v2519_v19, 0.0 }
 0x4ac   :  { %2383 = vmatpush3.msra.mxu1 %v1688_v21  ;;  %1520 = vadd.xlane.f32.xlu0 %v1519_v22  ;;  %v2189_v21 = vld [vmem:[%s3172_s10] ss:$0 sm:$0xff] }
 0x4ad   :  { %2384 = vmatprep.mubr.msk.f32.mxu1 %vm2696_vm1, %v2695_v48 }
 0x4af   :  { %2385 = vmatmul.mubr.msk.f32.vlgmr.msra.gmra.mrb[20].mxu1 %vm434_vm2, %v2517_v18  ;;  %1192 = vadd.xlane.f32.xlu1 %v1191_v23 }
 0x4b0   :  { %518 = vadd.xlane.f32.xlu0 %v517_v24 }
 0x4c9   :  { %v3081_v25 = vpop.f32.mrb[6].mxu1 }
 0x4ca   :  { %v2316_v26 = vpop.f32.mrb[7].mxu1 }
 0x4f7   :  { %v681_v27 = vpop.xlane.xlu0 %680 }
 0x4f8   :  { %2520 = vrcp.f32 %v681_v27 }
 0x4fb   :  { %v847_v28 = vpop.xlane.xlu1 %846 }
 0x4fc   :  { %2522 = vrcp.f32 %v847_v28 }
 0x4ff   :  { %v1012_v29 = vpop.xlane.xlu0 %1011 }
 0x500   :  { %2524 = vrcp.f32 %v1012_v29 }
 0x502   :  { %v2521_v30 = vpop.eup %2520 }
 0x506   :  { %v2523_v33 = vpop.eup %2522 }
 0x50a   :  { %v2525_v37 = vpop.eup %2524 }
 0x534   :  { %v1355_v43 = vpop.xlane.xlu0 %1354 }
 0x535   :  { %2526 = vrcp.f32 %v1355_v43 }
 0x538   :  { %v1686_v52 = vpop.xlane.xlu1 %1685 }
 0x539   :  { %v1521_v47 = vpop.xlane.xlu0 %1520 }
 0x53a   :  { %2528 = vrcp.f32 %v1521_v47 }
 0x53b   :  { %2530 = vrcp.f32 %v1686_v52 }
 0x53c   :  { %v1193_v5 = vpop.xlane.xlu1 %1192 }
 0x53d   :  { %v519_v4 = vpop.xlane.xlu0 %518 }
 0x53e   :  { %v755_v48 = vpop.f32.mrb[8].mxu1  ;;  %2532 = vrcp.f32 %v519_v4 }
 0x53f   :  { %v760_v31 = vmul.f32 %v2521_v30, %v755_v48  ;;  %v2326_v32 = vpop.f32.mrb[9].mxu1  ;;  %v2527_v54 = vpop.eup %2526  ;;  %2534 = vrcp.f32 %v1193_v5  ;;  %v2038_v5 = vld [vmem:[%s3177_s15 + $0x20] sm:$0xff] }
 0x541   :  { %1092 = vrot.lane.b32.xlu0 %v760_v31, %s2691_s22 }
 0x542   :  { %v920_v34 = vpop.f32.mrb[10].mxu1 }
 0x543   :  { %v925_v35 = vmul.f32 %v2523_v33, %v920_v34  ;;  %v2336_v36 = vpop.f32.mrb[11].mxu1 }
 0x544   :  { %v2529_v58 = vpop.eup %2528 }
 0x545   :  { %1096 = vrot.lane.b32.xlu1 %v925_v35, %s2700_s6  ;;  %v2531_v62 = vpop.eup %2530 }
 0x546   :  { %v1085_v38 = vpop.f32.mrb[12].mxu1 }
 0x547   :  { %v1090_v39 = vmul.f32 %v2525_v37, %v1085_v38  ;;  %v2346_v40 = vpop.f32.mrb[13].mxu1  ;;  %v1918_v37 = vld [vmem:[#allocation7] sm:$0xff]  ;;  %v1919_v38 = vld [vmem:[#allocation7 + $0x8] sm:$0xff] }
 0x548   :  { %v2533_v6 = vpop.eup %2532  ;;  %v1920_v40 = vld [vmem:[#allocation7 + $0x10] sm:$0xff] }
 0x549   :  { %1100 = vrot.lane.b32.xlu1 %v1090_v39, %s2701_s28  ;;  %v594_v9 = vmul.f32 %v2533_v6, %v3081_v25  ;;  %v2535_v13 = vpop.eup %2534  ;;  %v2460_v39 = vpack.c.bf16 %v1919_v38, %v1918_v37  ;;  %v2039_v6 = vld [vmem:[%s3177_s15 + $0x28] sm:$0xff] }
 0x54a   :  { %v1263_v41 = vpop.f32.mrb[14].mxu1 }
 0x54b   :  { %v2356_v42 = vpop.f32.mrb[15].mxu1  ;;  %v1268_v15 = vmul.f32 %v2535_v13, %v1263_v41  ;;  %2461 = vmatprep.subr.bf16.mxu1 %v2460_v39  ;;  %v1921_v41 = vld [vmem:[#allocation7 + $0x18] sm:$0xff] }
 0x54c   :  { %2463 = vmatpush3.bf16.msra.mxu1 %v2460_v39  ;;  %v2464_v42 = vpack.c.bf16 %v1921_v41, %v1920_v40 }
 0x54e   :  { %2465 = vmatprep.subr.bf16.mxu1 %v2464_v42 }
 0x550   :  { %2467 = vmatpush3.bf16.msra.mxu1 %v2464_v42 }
 0x579   :  { %v1429_v55 = vpop.f32.mrb[16].mxu1 }
 0x57a   :  { %v1434_v56 = vmul.f32 %v2527_v54, %v1429_v55  ;;  %v2366_v57 = vpop.f32.mrb[17].mxu1  ;;  %v2193_v54 = vld [vmem:[%s3174_s12] ss:$0 sm:$0xff] }
 0x57c   :  { %1766 = vrot.lane.b32.xlu1 %v1434_v56, %s2691_s22 }
 0x57e   :  { %v1594_v59 = vpop.f32.mrb[18].mxu1 }
 0x57f   :  { %v1599_v60 = vmul.f32 %v2529_v58, %v1594_v59  ;;  %v2376_v61 = vpop.f32.mrb[19].mxu1 }
 0x580   :  { %v2034_v61 = vld [vmem:[%s3177_s15] sm:$0xff] }
 0x581   :  { %1770 = vrot.lane.b32.xlu0 %v1599_v60, %s2700_s6 }
 0x582   :  { %v1759_v63 = vpop.f32.mrb[20].mxu1 }
 0x583   :  { %v1764_v2 = vmul.f32 %v2531_v62, %v1759_v63  ;;  %v2386_v3 = vpop.f32.mrb[21].mxu1  ;;  %v2035_v62 = vld [vmem:[%s3177_s15 + $0x8] sm:$0xff]  ;;  %v2036_v63 = vld [vmem:[%s3177_s15 + $0x10] sm:$0xff] }
 0x584   :  { %v2037_v3 = vld [vmem:[%s3177_s15 + $0x18] sm:$0xff] }
 0x585   :  { %1774 = vrot.lane.b32.xlu1 %v1764_v2, %s2701_s28  ;;  %v2468_v2 = vpack.c.bf16 %v2035_v62, %v2034_v61  ;;  %v2472_v4 = vpack.c.bf16 %v2037_v3, %v2036_v63 }
 0x587   :  { %2469 = vmatprep.subr.bf16.mxu0 %v2468_v2 }
 0x5b3   :  { %v1093_v7 = vpop.permute.xlu0 %1092 }
 0x5b4   :  { %v1103_v53 = vsel %vm434_vm2, %v594_v9, %v1093_v7  ;;  %v2476_v7 = vpack.c.bf16 %v2039_v6, %v2038_v5  ;;  %v2041_v9 = vld [vmem:[%s3177_s15 + $0x38] sm:$0xff] }
 0x5b7   :  { %v1097_v8 = vpop.permute.xlu1 %1096 }
 0x5b8   :  { %v1105_v10 = vsel %vm1104_vm3, %v1103_v53, %v1097_v8  ;;  %v2040_v8 = vld [vmem:[%s3177_s15 + $0x30] sm:$0xff]  ;;  %s2703_s15 = smov [#allocation11]  }
 0x5b9   :  { %v2480_v53 = vpack.c.bf16 %v2041_v9, %v2040_v8  ;;  %s2140_s4 = sshll.u32 %s2703_s15, 4  ;;  %s2141_s4 = int_to_ptr.vmem [resolvable:$true] %s2140_s4 }
 0x5ba   :  { %s2658_s8 = scalar_lea.vmem %s2141_s4, 256  ;;  %p2663_p13 = scmp.lt.s32.totalorder %s2141_s4, %s2141_s4 }
 0x5bb   :  { %v1101_v11 = vpop.permute.xlu1 %1100  ;;  %p2659_p12 = scmp.ne.s32.totalorder %s2141_s4, %s2658_s8  ;;  %p2664_p0 = scmp.lt.s32.totalorder %s2658_s8, %s2658_s8 }
 0x5bc   :  { %v1107_v12 = vsel %vm1106_vm4, %v1105_v10, %v1101_v11  ;;  %v2194_v10 = vld [vmem:[#allocation8] ss:$0 sm:$0xff] }
 0x5bd   :  { %2395 = vmatprep.mubr.msk.f32.mxu0 %vm125_vm0, %v1107_v12  ;;  %p2665_p1 = por %p2664_p0, %p2663_p13 }
 0x5bf   :  { %p2666_p2 = pnand %p2665_p1, %p2659_p12 }
 0x5ee   :  { %v1767_v14 = vpop.permute.xlu1 %1766 }
 0x5ef   :  { %v1777_v17 = vsel %vm434_vm2, %v1268_v15, %v1767_v14 }
 0x5f3   :  { %v1771_v16 = vpop.permute.xlu0 %1770 }
 0x5f4   :  { %v1778_v18 = vsel %vm1104_vm3, %v1777_v17, %v1771_v16 }
 0x5f7   :  { %v1775_v19 = vpop.permute.xlu1 %1774 }
 0x5f8   :  { %v1779_v20 = vsel %vm1106_vm4, %v1778_v18, %v1775_v19 }
 0x5f9   :  { %2396 = vmatmul.mubr.msk.f32.vlgmr.msra.gmra.mrb[16].mxu0 %vm125_vm0, %v1779_v20 }
 0x5fa   :  { %2471 = vmatpush3.bf16.msra.mxu0 %v2468_v2 }
 0x5fb   :  { %2473 = vmatprep.subr.bf16.mxu0 %v2472_v4 }
 0x5fe   :  { %2475 = vmatpush3.bf16.msra.mxu0 %v2472_v4 }
 0x5ff   :  { %2477 = vmatprep.subr.bf16.mxu0 %v2476_v7 }
 0x602   :  { %2479 = vmatpush3.bf16.msra.mxu0 %v2476_v7 }
 0x603   :  { %2481 = vmatprep.subr.bf16.mxu0 %v2480_v53 }
 0x606   :  { %2483 = vmatpush3.bf16.msra.mxu0 %v2480_v53 }
 0x6cc   :  { %v2397_v22 = vpop.f32.mrb[16].mxu0 }
 0x6cd   :  { %v1869_v23 = vadd.f32 %v2397_v22, %v2189_v21  ;;  %v1863_v24 = vpop.f32.mrb[17].mxu0 }
 0x6ce   :  { %v1864_v25 = vadd.f32 %v2189_v21, %v1863_v24 }
 0x6cf   :  { %v3098_v26 = vadd.f32 %v1869_v23, %v2880_v1 }
 0x6d0   :  { %v3101_v27 = vadd.f32 %v1864_v25, %v2878_v0 }
 0x6d1   :  { %v1879_v28 = vsel %vm125_vm0, %v3098_v26, 0.0 }
 0x6d2   :  { %1880 = vadd.xlane.f32.xlu1 %v1879_v28  ;;  %v1876_v29 = vsel %vm125_vm0, %v3101_v27, 0.0 }
 0x6d3   :  { %1877 = vadd.xlane.f32.xlu0 %v1876_v29 }
 0x75f   :  { %v1881_v30 = vpop.xlane.xlu1 %1880 }
 0x760   :  { %v1883_v48 = vmul.f32 0.03125, %v1881_v30  ;;  %v1878_v31 = vpop.xlane.xlu0 %1877 }
 0x761   :  { %v1882_v32 = vmul.f32 0.03125, %v1878_v31 }
 0x762   :  { %v1885_v33 = vsub.f32 %v3098_v26, %v1883_v48  ;;  %v2199_v48 = vld [vmem:[#allocation10] ss:$0 sm:$0xff] }
 0x763   :  { %v1884_v1 = vsub.f32 %v3101_v27, %v1882_v32 }
 0x764   :  { %v1887_v35 = vmul.f32 %v1885_v33, %v1885_v33 }
 0x765   :  { %v1886_v34 = vmul.f32 %v1884_v1, %v1884_v1 }
 0x766   :  { %v1891_v36 = vsel %vm125_vm0, %v1887_v35, 0.0 }
 0x767   :  { %v1888_v0 = vsel %vm125_vm0, %v1886_v34, 0.0 }
 0x768   :  { %1889 = vadd.xlane.f32.xlu0 %v1888_v0 }
 0x76c   :  { %1892 = vadd.xlane.f32.xlu0 %v1891_v36 }
 0x7f5   :  { %v1890_v43 = vpop.xlane.xlu0 %1889 }
 0x7f6   :  { %v1894_v44 = vmul.f32 0.03125, %v1890_v43 }
 0x7f8   :  { %v1896_v45 = vadd.f32 1e-05, %v1894_v44 }
 0x7f9   :  { %v1893_v46 = vpop.xlane.xlu0 %1892 }
 0x7fa   :  { %2536 = vrsqrt.f32 %v1896_v45  ;;  %v1895_v47 = vmul.f32 0.03125, %v1893_v46 }
 0x7fc   :  { %v1897_v49 = vadd.f32 1e-05, %v1895_v47 }
 0x7fe   :  { %2538 = vrsqrt.f32 %v1897_v49 }
 0x804   :  { %v2537_v50 = vpop.eup %2536 }
 0x805   :  { %v1900_v52 = vmul.f32 %v2537_v50, %v1884_v1 }
 0x807   :  { %v1908_v55 = vmul.f32 %v2192_v51, %v1900_v52 }
 0x808   :  { %v2539_v56 = vpop.eup %2538 }
 0x809   :  { %v1901_v57 = vmul.f32 %v2539_v56, %v1885_v33  ;;  %v1916_v58 = vadd.f32 %v2193_v54, %v1908_v55 }
 0x80b   :  { %v1909_v59 = vmul.f32 %v2192_v51, %v1901_v57  ;;  %2406 = vmatprep.mubr.msk.f32.mxu1 %vm125_vm0, %v1916_v58 }
 0x80d   :  { %v1917_v60 = vadd.f32 %v2193_v54, %v1909_v59 }
 0x80f   :  { %2407 = vmatmul.mubr.msk.f32.vlgmr.msra.gmra.mrb[22].mxu1 %vm125_vm0, %v1917_v60 }
 0x8e2   :  { %v2408_v11 = vpop.f32.mrb[22].mxu1 }
 0x8e3   :  { %v2007_v12 = vadd.f32 %v2408_v11, %v2194_v10  ;;  %v2001_v13 = vpop.f32.mrb[23].mxu1 }
 0x8e4   :  { %v2002_v14 = vadd.f32 %v2194_v10, %v2001_v13 }
 0x8e5   :  { %2028 = vrot.lane.b32.xlu1 %v2007_v12, %s2702_s13  ;;  %v2198_v16 = vmul.f32 -1.442695, %v2007_v12 }
 0x8e6   :  { %2026 = vrot.lane.b32.xlu0 %v2002_v14, %s2702_s13  ;;  %v2197_v15 = vmul.f32 -1.442695, %v2002_v14 }
 0x8e8   :  { %2540 = vpow2.f32 %v2197_v15 }
 0x8e9   :  { %2542 = vpow2.f32 %v2198_v16 }
 0x8f2   :  { %v2541_v17 = vpop.eup %2540 }
 0x8f3   :  { %v2543_v18 = vpop.eup %2542  ;;  %v2016_v19 = vadd.f32 1.0, %v2541_v17 }
 0x8f4   :  { %v2017_v20 = vadd.f32 1.0, %v2543_v18 }
 0x8f5   :  { %2544 = vrcp.f32 %v2016_v19 }
 0x8f6   :  { %2546 = vrcp.f32 %v2017_v20 }
 0x8ff   :  { %v2545_v21 = vpop.eup %2544 }
 0x900   :  { %v2547_v22 = vpop.eup %2546  ;;  %v2022_v24 = vmul.f32 %v2545_v21, %v2002_v14 }
 0x901   :  { %v2023_v25 = vmul.f32 %v2547_v22, %v2007_v12 }
 0x957   :  { %v2029_v23 = vpop.permute.xlu1 %2028 }
 0x958   :  { %v2027_v28 = vpop.permute.xlu0 %2026  ;;  %v2033_v30 = vmul.f32 %v2029_v23, %v2023_v25 }
 0x959   :  { %v2032_v29 = vmul.f32 %v2027_v28, %v2022_v24 }
 0x95b   :  { %2425 = vmatprep.mubr.msk.f32.mxu0 %vm2049_vm5, %v2032_v29 }
 0x95c   :  { %2426 = vmatmul.mubr.msk.f32.vlgmr.msra.gmra.mrb[18].mxu0 %vm2049_vm5, %v2033_v30 }
 0xa2f   :  { %v2427_v31 = vpop.f32.mrb[18].mxu0 }
 0xa30   :  { %v2128_v32 = vadd.f32 %v2427_v31, %v2199_v48  ;;  %v2122_v33 = vpop.f32.mrb[19].mxu0 }
 0xa31   :  { %v2123_v1 = vadd.f32 %v2199_v48, %v2122_v33 }
 0xa32   :  { %v2132_v34 = vadd.f32 %v2128_v32, %v3098_v26 }
 0xa33   :  { %v2131_v0 = vadd.f32 %v2123_v1, %v3101_v27 }
 0xa34   :  { %2134 = vst.msk [vmem:[#allocation11 + $0x8] sm:$0xff] %vm125_vm0, %v2132_v34 }
 0xa35   :  { %2133 = vst.msk [vmem:[#allocation11] sm:$0xff] %vm125_vm0, %v2131_v0 }
 0xa36   :  { %2669 = shalt.err (!%p2666_p2)
}
 0xa37   :  { %s2670_s19 = scalar_lea.hbm %s3179_s17, 256 }
 0xa38   :  { %p2671_p3 = scmp.ne.s32.totalorder %s3179_s17, %s2670_s19  ;;  %p2674_p4 = scmp.lt.u32.totalorder %s2670_s19, %s3179_s17 }
 0xa3a   :  { %p2676_p5 = pnand %p2674_p4, %p2671_p3 }
 0xa3c   :  { %2679 = shalt.err (!%p2676_p5)
}
 0xa3d   :  { %2146 = dma.vmem_to_hbm [thread:$0]  %s2141_s4, 256, %s3179_s17, [#allocation4], %s3186_s27, %s3186_s27, %s2691_s22  }
 0xa3e   :  { %2686 = dma.done.wait [#allocation4], 256  }
 0xa3f   :  { %2687 = vsyncadd [#allocation4], 4294967040 }
 0xa40   :  { %2150 = vsyncpa [#allocation3], 1 }
 0xa41   :  { %2151 = vsyncpa [#allocation6], 1 }
 0xa42   :  { %2152 = vsyncpa [#allocation9], 1 }
 0xa43   :  { %2153 = vsyncpa [#allocation4], 1 }

</bundles_post_ra>
